<compile_context>
chip_gen: v7x
topology: tpu7x:2x2x1
jax: 0.10.0
libtpu: 0.0.40
codegen_flags: <defaults>
</compile_context>

<pallas_src>
import jax
import jax.numpy as jnp
from jax.experimental import pallas as pl
from jax.experimental.pallas import tpu as pltpu

EPS = 1e-5          # nn.BatchNorm1d default eps
NEG_SLOPE = 0.01    # nn.LeakyReLU default negative_slope


def _batchnorm_train(h, inv_batch):
    # Training-mode BN (affine=False): biased variance, eps inside rsqrt.
    # Single fused pass over h: sum and sum-of-squares together.
    s1 = jnp.sum(h, axis=0, keepdims=True)
    s2 = jnp.sum(h * h, axis=0, keepdims=True)
    mean = s1 * inv_batch
    var = s2 * inv_batch - mean * mean
    return (h - mean) * jax.lax.rsqrt(var + EPS)


def _leaky_relu(h):
    # equivalent to where(h>0, h, slope*h) for 0 < slope < 1, one mul + one max
    return jnp.maximum(h, NEG_SLOPE * h)


def ae_kernel(x_ref, we1_ref, we2_ref, we3_ref, wd1_ref, wd2_ref, wd3_ref, out_ref):
    inv_b = 1.0 / x_ref.shape[0]  # static python float

    def dense(a_f32, w_ref):
        # bf16 MXU operands, f32 accumulation
        return jnp.dot(a_f32.astype(w_ref.dtype), w_ref[...],
                       preferred_element_type=jnp.float32)

    h = x_ref[...]
    # --- encoder ---
    h = _leaky_relu(_batchnorm_train(dense(h, we1_ref), inv_b))
    h = _leaky_relu(_batchnorm_train(dense(h, we2_ref), inv_b))
    z = dense(h, we3_ref)
    # --- decoder ---
    h = _leaky_relu(_batchnorm_train(dense(z, wd1_ref), inv_b))
    h = _leaky_relu(_batchnorm_train(dense(h, wd2_ref), inv_b))
    out_ref[...] = dense(h, wd3_ref).astype(out_ref.dtype)


def autoencoder_forward(x, weights, *, mxu_dtype=jnp.bfloat16):
    """x: (batch, x_dim) f32; weights: 6 (in, out) matrices
    (enc0, enc1, enc_rep, dec0, dec1, dec_out), pre-transposed from nn.Linear."""
    batch, _ = x.shape
    x_dim = weights[-1].shape[1]
    f32 = 4

    # Store weights in bf16 for the MXU / halve weight DMA bytes.
    w_mxu = [w.astype(mxu_dtype) for w in weights]

    vmem_spec = pl.BlockSpec(memory_space=pltpu.MemorySpace.VMEM)

    # --- cost estimate hint for the XLA scheduler ---
    flops = 2 * batch * sum(int(w.shape[0]) * int(w.shape[1]) for w in weights)
    bn_widths = [int(weights[i].shape[1]) for i in (0, 1, 3, 4)]
    transcendentals = sum(bn_widths)  # one rsqrt per BN feature
    bytes_accessed = (
        x.size * f32
        + sum(w.size * w.dtype.itemsize for w in w_mxu)
        + batch * x_dim * f32
    )
    cost = pl.CostEstimate(flops=flops, transcendentals=transcendentals,
                           bytes_accessed=bytes_accessed)

    # --- VMEM budget (explicit so it also fits v7x's 64 MiB / 32 MiB scoped) ---
    max_width = max([x.shape[1]] + [int(w.shape[1]) for w in weights])
    act_bytes = batch * max_width * f32
    vmem_need = (
        2 * (x.size * f32 + batch * x_dim * f32)              # in/out buffers
        + 2 * sum(w.size * w.dtype.itemsize for w in w_mxu)   # resident weights
        + 6 * act_bytes                                       # live intermediates
    )
    vmem_limit = int(min(max(vmem_need + (2 << 20), 4 << 20), 32 << 20))

    return pl.pallas_call(
        ae_kernel,
        out_shape=jax.ShapeDtypeStruct((batch, x_dim), jnp.float32),
        in_specs=[vmem_spec] * (1 + len(w_mxu)),
        out_specs=vmem_spec,
        compiler_params=pltpu.CompilerParams(vmem_limit_bytes=vmem_limit),
        cost_estimate=cost,
    )(x, *w_mxu)


def init_weights(key, x_dim, h_dims, rep_dim):
    # nn.Linear(in, out, bias=False) init: U(-1/sqrt(in), 1/sqrt(in)),
    # stored pre-transposed as (in, out).
    enc = [x_dim, *h_dims, rep_dim]
    dec = [rep_dim, *reversed(h_dims), x_dim]
    layer_dims = list(zip(enc[:-1], enc[1:])) + list(zip(dec[:-1], dec[1:]))
    weights = []
    for fin, fout in layer_dims:
        key, sub = jax.random.split(key)
        bound = 1.0 / (fin ** 0.5)
        weights.append(
            jax.random.uniform(sub, (fin, fout), jnp.float32, -bound, bound))
    return weights


def _reference_forward(x, weights, mxu_dtype=jnp.bfloat16):
    # Pure-JAX reference replicating the kernel's math path (bf16 dots, f32 BN).
    def dense(a, w):
        return jnp.dot(a.astype(mxu_dtype), w.astype(mxu_dtype),
                       preferred_element_type=jnp.float32)

    def bn(h):
        mean = jnp.mean(h, axis=0, keepdims=True)
        var = jnp.mean(h * h, axis=0, keepdims=True) - mean * mean
        return (h - mean) * jax.lax.rsqrt(var + EPS)

    def lrelu(h):
        return jnp.maximum(h, NEG_SLOPE * h)

    h = x
    h = lrelu(bn(dense(h, weights[0])))
    h = lrelu(bn(dense(h, weights[1])))
    z = dense(h, weights[2])
    h = lrelu(bn(dense(z, weights[3])))
    h = lrelu(bn(dense(h, weights[4])))
    return dense(h, weights[5])


if __name__ == "__main__":
    x_dim, h_dims, rep_dim = 16, [32, 64], 8
    batch = 256  # >= 128 rows so every matmul fills the MXU height

    key = jax.random.PRNGKey(0)
    kx, kw = jax.random.split(key)
    x = jax.random.normal(kx, (batch, x_dim), dtype=jnp.float32)
    weights = init_weights(kw, x_dim, h_dims, rep_dim)

    out = autoencoder_forward(x, weights)
    jax.block_until_ready(out)

    assert out.shape == (batch, x_dim) and out.dtype == jnp.float32
    ref = _reference_forward(x, weights)
    assert bool(jnp.allclose(out, ref, rtol=1e-2, atol=1e-2)), "kernel/reference mismatch"
    print("KERNEL_OK")
</pallas_src>

<mosaic_0001>
module attributes {stable_mosaic.version = 11 : i64} {
  func.func @ae_kernel(%arg0: memref<256x16xf32, #tpu.memory_space<vmem>>, %arg1: memref<16x32xbf16, #tpu.memory_space<vmem>>, %arg2: memref<32x64xbf16, #tpu.memory_space<vmem>>, %arg3: memref<64x8xbf16, #tpu.memory_space<vmem>>, %arg4: memref<8x64xbf16, #tpu.memory_space<vmem>>, %arg5: memref<64x32xbf16, #tpu.memory_space<vmem>>, %arg6: memref<32x16xbf16, #tpu.memory_space<vmem>>, %arg7: memref<256x16xf32, #tpu.memory_space<vmem>>) attributes {dimension_semantics = [], scalar_prefetch = 0 : i64, scratch_operands = 0 : i64, tpu.core_type = #tpu.core_type<tc>} {
    %c0 = arith.constant 0 : index
    %c0_0 = arith.constant 0 : index
    %0 = vector.load %arg0[%c0, %c0_0] : memref<256x16xf32, #tpu.memory_space<vmem>>, vector<256x16xf32>
    %1 = arith.truncf %0 : vector<256x16xf32> to vector<256x16xbf16>
    %c0_1 = arith.constant 0 : index
    %c0_2 = arith.constant 0 : index
    %2 = vector.load %arg1[%c0_1, %c0_2] : memref<16x32xbf16, #tpu.memory_space<vmem>>, vector<16x32xbf16>
    %cst = arith.constant dense<0.000000e+00> : vector<256x32xf32>
    %3 = tpu.matmul %1, %2, %cst {dimension_numbers = #tpu.dot_dimension_numbers<[1], [0], [0], [1], [0, 0, 1, 1], [], []>} : vector<256x16xbf16>, vector<16x32xbf16>, vector<256x32xf32> -> vector<256x32xf32>
    %cst_3 = arith.constant dense<0.000000e+00> : vector<32xf32>
    %4 = vector.multi_reduction <add>, %3, %cst_3 [0] : vector<256x32xf32> to vector<32xf32>
    %5 = vector.shape_cast %4 : vector<32xf32> to vector<1x32xf32>
    %6 = arith.mulf %3, %3 : vector<256x32xf32>
    %cst_4 = arith.constant dense<0.000000e+00> : vector<32xf32>
    %7 = vector.multi_reduction <add>, %6, %cst_4 [0] : vector<256x32xf32> to vector<32xf32>
    %8 = vector.shape_cast %7 : vector<32xf32> to vector<1x32xf32>
    %cst_5 = arith.constant 3.906250e-03 : f32
    %9 = vector.broadcast %cst_5 : f32 to vector<1x32xf32>
    %10 = arith.mulf %5, %9 : vector<1x32xf32>
    %cst_6 = arith.constant 3.906250e-03 : f32
    %11 = vector.broadcast %cst_6 : f32 to vector<1x32xf32>
    %12 = arith.mulf %8, %11 : vector<1x32xf32>
    %13 = arith.mulf %10, %10 : vector<1x32xf32>
    %14 = arith.subf %12, %13 : vector<1x32xf32>
    %15 = vector.broadcast %10 : vector<1x32xf32> to vector<256x32xf32>
    %16 = arith.subf %3, %15 : vector<256x32xf32>
    %cst_7 = arith.constant 9.99999974E-6 : f32
    %17 = vector.broadcast %cst_7 : f32 to vector<1x32xf32>
    %18 = arith.addf %14, %17 : vector<1x32xf32>
    %19 = math.rsqrt %18 : vector<1x32xf32>
    %20 = vector.broadcast %19 : vector<1x32xf32> to vector<256x32xf32>
    %21 = arith.mulf %16, %20 : vector<256x32xf32>
    %cst_8 = arith.constant 0.00999999977 : f32
    %22 = vector.broadcast %cst_8 : f32 to vector<256x32xf32>
    %23 = arith.mulf %22, %21 : vector<256x32xf32>
    %24 = arith.maximumf %21, %23 : vector<256x32xf32>
    %25 = arith.truncf %24 : vector<256x32xf32> to vector<256x32xbf16>
    %c0_9 = arith.constant 0 : index
    %c0_10 = arith.constant 0 : index
    %26 = vector.load %arg2[%c0_9, %c0_10] : memref<32x64xbf16, #tpu.memory_space<vmem>>, vector<32x64xbf16>
    %cst_11 = arith.constant dense<0.000000e+00> : vector<256x64xf32>
    %27 = tpu.matmul %25, %26, %cst_11 {dimension_numbers = #tpu.dot_dimension_numbers<[1], [0], [0], [1], [0, 0, 1, 1], [], []>} : vector<256x32xbf16>, vector<32x64xbf16>, vector<256x64xf32> -> vector<256x64xf32>
    %cst_12 = arith.constant dense<0.000000e+00> : vector<64xf32>
    %28 = vector.multi_reduction <add>, %27, %cst_12 [0] : vector<256x64xf32> to vector<64xf32>
    %29 = vector.shape_cast %28 : vector<64xf32> to vector<1x64xf32>
    %30 = arith.mulf %27, %27 : vector<256x64xf32>
    %cst_13 = arith.constant dense<0.000000e+00> : vector<64xf32>
    %31 = vector.multi_reduction <add>, %30, %cst_13 [0] : vector<256x64xf32> to vector<64xf32>
    %32 = vector.shape_cast %31 : vector<64xf32> to vector<1x64xf32>
    %cst_14 = arith.constant 3.906250e-03 : f32
    %33 = vector.broadcast %cst_14 : f32 to vector<1x64xf32>
    %34 = arith.mulf %29, %33 : vector<1x64xf32>
    %cst_15 = arith.constant 3.906250e-03 : f32
    %35 = vector.broadcast %cst_15 : f32 to vector<1x64xf32>
    %36 = arith.mulf %32, %35 : vector<1x64xf32>
    %37 = arith.mulf %34, %34 : vector<1x64xf32>
    %38 = arith.subf %36, %37 : vector<1x64xf32>
    %39 = vector.broadcast %34 : vector<1x64xf32> to vector<256x64xf32>
    %40 = arith.subf %27, %39 : vector<256x64xf32>
    %cst_16 = arith.constant 9.99999974E-6 : f32
    %41 = vector.broadcast %cst_16 : f32 to vector<1x64xf32>
    %42 = arith.addf %38, %41 : vector<1x64xf32>
    %43 = math.rsqrt %42 : vector<1x64xf32>
    %44 = vector.broadcast %43 : vector<1x64xf32> to vector<256x64xf32>
    %45 = arith.mulf %40, %44 : vector<256x64xf32>
    %cst_17 = arith.constant 0.00999999977 : f32
    %46 = vector.broadcast %cst_17 : f32 to vector<256x64xf32>
    %47 = arith.mulf %46, %45 : vector<256x64xf32>
    %48 = arith.maximumf %45, %47 : vector<256x64xf32>
    %49 = arith.truncf %48 : vector<256x64xf32> to vector<256x64xbf16>
    %c0_18 = arith.constant 0 : index
    %c0_19 = arith.constant 0 : index
    %50 = vector.load %arg3[%c0_18, %c0_19] : memref<64x8xbf16, #tpu.memory_space<vmem>>, vector<64x8xbf16>
    %cst_20 = arith.constant dense<0.000000e+00> : vector<256x8xf32>
    %51 = tpu.matmul %49, %50, %cst_20 {dimension_numbers = #tpu.dot_dimension_numbers<[1], [0], [0], [1], [0, 0, 1, 1], [], []>} : vector<256x64xbf16>, vector<64x8xbf16>, vector<256x8xf32> -> vector<256x8xf32>
    %52 = arith.truncf %51 : vector<256x8xf32> to vector<256x8xbf16>
    %c0_21 = arith.constant 0 : index
    %c0_22 = arith.constant 0 : index
    %53 = vector.load %arg4[%c0_21, %c0_22] : memref<8x64xbf16, #tpu.memory_space<vmem>>, vector<8x64xbf16>
    %cst_23 = arith.constant dense<0.000000e+00> : vector<256x64xf32>
    %54 = tpu.matmul %52, %53, %cst_23 {dimension_numbers = #tpu.dot_dimension_numbers<[1], [0], [0], [1], [0, 0, 1, 1], [], []>} : vector<256x8xbf16>, vector<8x64xbf16>, vector<256x64xf32> -> vector<256x64xf32>
    %cst_24 = arith.constant dense<0.000000e+00> : vector<64xf32>
    %55 = vector.multi_reduction <add>, %54, %cst_24 [0] : vector<256x64xf32> to vector<64xf32>
    %56 = vector.shape_cast %55 : vector<64xf32> to vector<1x64xf32>
    %57 = arith.mulf %54, %54 : vector<256x64xf32>
    %cst_25 = arith.constant dense<0.000000e+00> : vector<64xf32>
    %58 = vector.multi_reduction <add>, %57, %cst_25 [0] : vector<256x64xf32> to vector<64xf32>
    %59 = vector.shape_cast %58 : vector<64xf32> to vector<1x64xf32>
    %cst_26 = arith.constant 3.906250e-03 : f32
    %60 = vector.broadcast %cst_26 : f32 to vector<1x64xf32>
    %61 = arith.mulf %56, %60 : vector<1x64xf32>
    %cst_27 = arith.constant 3.906250e-03 : f32
    %62 = vector.broadcast %cst_27 : f32 to vector<1x64xf32>
    %63 = arith.mulf %59, %62 : vector<1x64xf32>
    %64 = arith.mulf %61, %61 : vector<1x64xf32>
    %65 = arith.subf %63, %64 : vector<1x64xf32>
    %66 = vector.broadcast %61 : vector<1x64xf32> to vector<256x64xf32>
    %67 = arith.subf %54, %66 : vector<256x64xf32>
    %cst_28 = arith.constant 9.99999974E-6 : f32
    %68 = vector.broadcast %cst_28 : f32 to vector<1x64xf32>
    %69 = arith.addf %65, %68 : vector<1x64xf32>
    %70 = math.rsqrt %69 : vector<1x64xf32>
    %71 = vector.broadcast %70 : vector<1x64xf32> to vector<256x64xf32>
    %72 = arith.mulf %67, %71 : vector<256x64xf32>
    %cst_29 = arith.constant 0.00999999977 : f32
    %73 = vector.broadcast %cst_29 : f32 to vector<256x64xf32>
    %74 = arith.mulf %73, %72 : vector<256x64xf32>
    %75 = arith.maximumf %72, %74 : vector<256x64xf32>
    %76 = arith.truncf %75 : vector<256x64xf32> to vector<256x64xbf16>
    %c0_30 = arith.constant 0 : index
    %c0_31 = arith.constant 0 : index
    %77 = vector.load %arg5[%c0_30, %c0_31] : memref<64x32xbf16, #tpu.memory_space<vmem>>, vector<64x32xbf16>
    %cst_32 = arith.constant dense<0.000000e+00> : vector<256x32xf32>
    %78 = tpu.matmul %76, %77, %cst_32 {dimension_numbers = #tpu.dot_dimension_numbers<[1], [0], [0], [1], [0, 0, 1, 1], [], []>} : vector<256x64xbf16>, vector<64x32xbf16>, vector<256x32xf32> -> vector<256x32xf32>
    %cst_33 = arith.constant dense<0.000000e+00> : vector<32xf32>
    %79 = vector.multi_reduction <add>, %78, %cst_33 [0] : vector<256x32xf32> to vector<32xf32>
    %80 = vector.shape_cast %79 : vector<32xf32> to vector<1x32xf32>
    %81 = arith.mulf %78, %78 : vector<256x32xf32>
    %cst_34 = arith.constant dense<0.000000e+00> : vector<32xf32>
    %82 = vector.multi_reduction <add>, %81, %cst_34 [0] : vector<256x32xf32> to vector<32xf32>
    %83 = vector.shape_cast %82 : vector<32xf32> to vector<1x32xf32>
    %cst_35 = arith.constant 3.906250e-03 : f32
    %84 = vector.broadcast %cst_35 : f32 to vector<1x32xf32>
    %85 = arith.mulf %80, %84 : vector<1x32xf32>
    %cst_36 = arith.constant 3.906250e-03 : f32
    %86 = vector.broadcast %cst_36 : f32 to vector<1x32xf32>
    %87 = arith.mulf %83, %86 : vector<1x32xf32>
    %88 = arith.mulf %85, %85 : vector<1x32xf32>
    %89 = arith.subf %87, %88 : vector<1x32xf32>
    %90 = vector.broadcast %85 : vector<1x32xf32> to vector<256x32xf32>
    %91 = arith.subf %78, %90 : vector<256x32xf32>
    %cst_37 = arith.constant 9.99999974E-6 : f32
    %92 = vector.broadcast %cst_37 : f32 to vector<1x32xf32>
    %93 = arith.addf %89, %92 : vector<1x32xf32>
    %94 = math.rsqrt %93 : vector<1x32xf32>
    %95 = vector.broadcast %94 : vector<1x32xf32> to vector<256x32xf32>
    %96 = arith.mulf %91, %95 : vector<256x32xf32>
    %cst_38 = arith.constant 0.00999999977 : f32
    %97 = vector.broadcast %cst_38 : f32 to vector<256x32xf32>
    %98 = arith.mulf %97, %96 : vector<256x32xf32>
    %99 = arith.maximumf %96, %98 : vector<256x32xf32>
    %100 = arith.truncf %99 : vector<256x32xf32> to vector<256x32xbf16>
    %c0_39 = arith.constant 0 : index
    %c0_40 = arith.constant 0 : index
    %101 = vector.load %arg6[%c0_39, %c0_40] : memref<32x16xbf16, #tpu.memory_space<vmem>>, vector<32x16xbf16>
    %cst_41 = arith.constant dense<0.000000e+00> : vector<256x16xf32>
    %102 = tpu.matmul %100, %101, %cst_41 {dimension_numbers = #tpu.dot_dimension_numbers<[1], [0], [0], [1], [0, 0, 1, 1], [], []>} : vector<256x32xbf16>, vector<32x16xbf16>, vector<256x16xf32> -> vector<256x16xf32>
    %c0_42 = arith.constant 0 : index
    %c0_43 = arith.constant 0 : index
    %103 = vector.load %arg7[%c0_42, %c0_43] : memref<256x16xf32, #tpu.memory_space<vmem>>, vector<256x16xf32>
    tpu.vector_store %arg7[%c0_42, %c0_43], %102 {strides = array<i32>} : memref<256x16xf32, #tpu.memory_space<vmem>>, vector<256x16xf32>,
    return
  }
}

</mosaic_0001>

<bundles_post_ra>
// kernel: tpu_custom_call.1
= control target key start
LH: loop header
LB: loop body
LE: loop exit
PB: predicated region body
PF: predicated region fallthrough
CT: control target
= control target key end

     0   :  { %vm83_vm0 = vcmask 130048   ;;  %vm293_vm1 = vcmask 261120   ;;  %vm839_vm2 = vcmask 523264   ;;  %vm1467_vm3 = vcmask 1043456   ;;  %s5368_s1 = inlined_call_operand.vmem [shape: bf16[16,32], index: 1, kind: input, shape index: {}]   ;;  %s5369_s0 = inlined_call_operand.vmem [shape: f32[256,16], index: 0, kind: input, shape index: {}]   ;;  %s5370_s2 = inlined_call_operand.vmem [shape: bf16[32,64], index: 2, kind: input, shape index: {}]   ;;  %s5371_s3 = inlined_call_operand.vmem [shape: bf16[64,8], index: 3, kind: input, shape index: {}]   ;;  %s5372_s4 = inlined_call_operand.vmem [shape: bf16[8,64], index: 4, kind: input, shape index: {}]   ;;  %s5373_s5 = inlined_call_operand.vmem [shape: bf16[64,32], index: 5, kind: input, shape index: {}]   ;;  %s5374_s6 = inlined_call_operand.vmem [shape: bf16[32,16], index: 6, kind: input, shape index: {}]   ;;  %s5375_s7 = inlined_call_operand.vmem [shape: f32[256,16], index: 7, kind: output, shape index: {}]  }
   0x1   :  { %v3214_v0 = vld [vmem:[%s5368_s1] sm:$0xff]   ;;  %v28_v2 = vld [vmem:[%s5369_s0 + $0x8] sm:$0xff]  ;;  %v29_v3 = vld [vmem:[%s5369_s0 + $0x10] sm:$0xff]  ;;  %vm1418_vm4 = vcmask 64512  }
   0x2   :  { %v27_v1 = vld [vmem:[%s5369_s0] sm:$0xff]  ;;  %2993 = vmatprep.subr.bf16.mxu0 %v3214_v0  ;;  %v30_v5 = vld [vmem:[%s5369_s0 + $0x18] sm:$0xff]  ;;  %v32_v7 = vld [vmem:[%s5369_s0 + $0x28] sm:$0xff] }
   0x3   :  { %v59_v4 = vpack.c.bf16 %v28_v2, %v27_v1  ;;  %v31_v6 = vld [vmem:[%s5369_s0 + $0x20] sm:$0xff]  ;;  %2994 = vmatpush3.bf16.msra.mxu0 %v3214_v0  ;;  %v60_v8 = vpack.c.bf16 %v30_v5, %v29_v3  ;;  %v33_v10 = vld [vmem:[%s5369_s0 + $0x30] sm:$0xff]  ;;  %v34_v11 = vld [vmem:[%s5369_s0 + $0x38] sm:$0xff] }
   0x4   :  { %v61_v9 = vpack.c.bf16 %v32_v7, %v31_v6  ;;  %v35_v12 = vld [vmem:[%s5369_s0 + $0x40] sm:$0xff]  ;;  %v36_v13 = vld [vmem:[%s5369_s0 + $0x48] sm:$0xff]  ;;  %v62_v14 = vpack.c.bf16 %v34_v11, %v33_v10  ;;  %v37_v16 = vld [vmem:[%s5369_s0 + $0x50] sm:$0xff] }
   0x5   :  { %2995 = vmatprep.mubr.msk.bf16.mxu0 %vm83_vm0, %v59_v4  ;;  %v63_v15 = vpack.c.bf16 %v36_v13, %v35_v12  ;;  %v38_v17 = vld [vmem:[%s5369_s0 + $0x58] sm:$0xff]  ;;  %v39_v18 = vld [vmem:[%s5369_s0 + $0x60] sm:$0xff]  ;;  %v40_v19 = vld [vmem:[%s5369_s0 + $0x68] sm:$0xff] }
   0x6   :  { %2996 = vmatmul.mubr.msk.bf16.vlgmr.msra.gmra.mrb[0].mxu0 %vm83_vm0, %v60_v8  ;;  %v64_v20 = vpack.c.bf16 %v38_v17, %v37_v16  ;;  %v65_v21 = vpack.c.bf16 %v40_v19, %v39_v18  ;;  %v41_v22 = vld [vmem:[%s5369_s0 + $0x70] sm:$0xff]  ;;  %v42_v23 = vld [vmem:[%s5369_s0 + $0x78] sm:$0xff]  ;;  %v43_v24 = vld [vmem:[%s5369_s0 + $0x80] sm:$0xff] }
   0x7   :  { %2999 = vmatprep.mubr.msk.bf16.mxu0 %vm83_vm0, %v61_v9  ;;  %v44_v25 = vld [vmem:[%s5369_s0 + $0x88] sm:$0xff]  ;;  %v66_v26 = vpack.c.bf16 %v42_v23, %v41_v22  ;;  %v45_v28 = vld [vmem:[%s5369_s0 + $0x90] sm:$0xff]  ;;  %v46_v29 = vld [vmem:[%s5369_s0 + $0x98] sm:$0xff] }
   0x8   :  { %v67_v27 = vpack.c.bf16 %v44_v25, %v43_v24  ;;  %v47_v30 = vld [vmem:[%s5369_s0 + $0xa0] sm:$0xff]  ;;  %v48_v31 = vld [vmem:[%s5369_s0 + $0xa8] sm:$0xff]  ;;  %v68_v32 = vpack.c.bf16 %v46_v29, %v45_v28  ;;  %v49_v34 = vld [vmem:[%s5369_s0 + $0xb0] sm:$0xff] }
   0x9   :  { %v69_v33 = vpack.c.bf16 %v48_v31, %v47_v30  ;;  %v50_v35 = vld [vmem:[%s5369_s0 + $0xb8] sm:$0xff]  ;;  %v51_v36 = vld [vmem:[%s5369_s0 + $0xc0] sm:$0xff]  ;;  %v52_v37 = vld [vmem:[%s5369_s0 + $0xc8] sm:$0xff] }
   0xa   :  { %v70_v38 = vpack.c.bf16 %v50_v35, %v49_v34  ;;  %v71_v39 = vpack.c.bf16 %v52_v37, %v51_v36  ;;  %v53_v40 = vld [vmem:[%s5369_s0 + $0xd0] sm:$0xff]  ;;  %v54_v41 = vld [vmem:[%s5369_s0 + $0xd8] sm:$0xff]  ;;  %v55_v42 = vld [vmem:[%s5369_s0 + $0xe0] sm:$0xff] }
   0xb   :  { %v56_v43 = vld [vmem:[%s5369_s0 + $0xe8] sm:$0xff]  ;;  %v72_v44 = vpack.c.bf16 %v54_v41, %v53_v40  ;;  %v57_v46 = vld [vmem:[%s5369_s0 + $0xf0] sm:$0xff]  ;;  %v58_v47 = vld [vmem:[%s5369_s0 + $0xf8] sm:$0xff] }
   0xc   :  { %v73_v45 = vpack.c.bf16 %v56_v43, %v55_v42  ;;  %v74_v48 = vpack.c.bf16 %v58_v47, %v57_v46  ;;  %v3215_v49 = vld [vmem:[%s5370_s2] sm:$0xff]   ;;  %v3216_v50 = vld [vmem:[%s5370_s2 + $0x8] sm:$0xff]  }
   0xd   :  { %3027 = vmatprep.subr.bf16.mxu1 %v3215_v49 }
   0xe   :  { %3000 = vmatmul.mubr.msk.bf16.gmra.mrb[4].mxu0 %vm83_vm0, %v62_v14  ;;  %3028 = vmatpush3.bf16.msra.mxu1 %v3215_v49 }
   0xf   :  { %3003 = vmatprep.mubr.msk.bf16.mxu0 %vm83_vm0, %v63_v15  ;;  %3029 = vmatprep.subr.bf16.mxu1 %v3216_v50 }
  0x12   :  { %3030 = vmatpush3.bf16.msra.mxu1 %v3216_v50 }
  0x16   :  { %3004 = vmatmul.mubr.msk.bf16.gmra.mrb[8].mxu0 %vm83_vm0, %v64_v20 }
  0x17   :  { %3007 = vmatprep.mubr.msk.bf16.mxu0 %vm83_vm0, %v65_v21 }
  0x1e   :  { %3008 = vmatmul.mubr.msk.bf16.gmra.mrb[12].mxu0 %vm83_vm0, %v66_v26 }
  0x1f   :  { %3011 = vmatprep.mubr.msk.bf16.mxu0 %vm83_vm0, %v67_v27 }
  0x26   :  { %3012 = vmatmul.mubr.msk.bf16.gmra.mrb[16].mxu0 %vm83_vm0, %v68_v32 }
  0x27   :  { %3015 = vmatprep.mubr.msk.bf16.mxu0 %vm83_vm0, %v69_v33 }
  0x2e   :  { %3016 = vmatmul.mubr.msk.bf16.gmra.mrb[20].mxu0 %vm83_vm0, %v70_v38 }
  0x2f   :  { %3019 = vmatprep.mubr.msk.bf16.mxu0 %vm83_vm0, %v71_v39 }
  0x36   :  { %3020 = vmatmul.mubr.msk.bf16.gmra.mrb[24].mxu0 %vm83_vm0, %v72_v44 }
  0x37   :  { %3023 = vmatprep.mubr.msk.bf16.mxu0 %vm83_vm0, %v73_v45 }
  0x3e   :  { %3024 = vmatmul.mubr.msk.bf16.gmra.mrb[28].mxu0 %vm83_vm0, %v74_v48 }
  0xd9   :  { %v3396_v51 = vpop.f32.mrb[0].mxu0 }
  0xda   :  { %v3398_v52 = vpop.f32.mrb[1].mxu0  ;;  %v365_v56 = vmul.f32 %v3396_v51, %v3396_v51  ;;  %v297_v61 = vsel %vm293_vm1, %v3396_v51, 0.0 }
  0xdb   :  { %v363_v53 = vmul.f32 %v3398_v52, %v3398_v52  ;;  %v3402_v54 = vpop.f32.mrb[2].mxu0  ;;  %v294_v57 = vsel %vm293_vm1, %v3398_v52, 0.0 }
  0xdc   :  { %v3404_v55 = vpop.f32.mrb[3].mxu0  ;;  %v366_v63 = vmul.f32 %v3402_v54, %v3402_v54  ;;  %v398_v3 = vsel %vm293_vm1, %v365_v56, 0.0  ;;  %v299_v4 = vsel %vm293_vm1, %v3402_v54, 0.0 }
  0xdd   :  { %v295_v58 = vsel %vm293_vm1, %v3404_v55, 0.0  ;;  %v364_v59 = vmul.f32 %v3404_v55, %v3404_v55  ;;  %v395_v62 = vsel %vm293_vm1, %v363_v53, 0.0 }
  0xde   :  { %v296_v60 = vadd.f32 %v295_v58, %v294_v57  ;;  %v400_v9 = vsel %vm293_vm1, %v366_v63, 0.0 }
  0xdf   :  { %v396_v0 = vsel %vm293_vm1, %v364_v59, 0.0 }
  0xe0   :  { %v298_v1 = vadd.f32 %v297_v61, %v296_v60  ;;  %v397_v2 = vadd.f32 %v396_v0, %v395_v62 }
  0xe1   :  { %v3423_v5 = vpop.f32.mrb[4].mxu0 }
  0xe2   :  { %v399_v6 = vadd.f32 %v398_v3, %v397_v2  ;;  %v3425_v7 = vpop.f32.mrb[5].mxu0  ;;  %v300_v8 = vadd.f32 %v299_v4, %v298_v1  ;;  %v369_v16 = vmul.f32 %v3423_v5, %v3423_v5  ;;  %v305_v22 = vsel %vm293_vm1, %v3423_v5, 0.0 }
  0xe3   :  { %v301_v10 = vsel %vm293_vm1, %v3425_v7, 0.0  ;;  %v367_v11 = vmul.f32 %v3425_v7, %v3425_v7  ;;  %v3432_v12 = vpop.f32.mrb[6].mxu0 }
  0xe4   :  { %v302_v13 = vadd.f32 %v301_v10, %v300_v8  ;;  %v401_v14 = vadd.f32 %v400_v9, %v399_v6  ;;  %v3434_v15 = vpop.f32.mrb[7].mxu0  ;;  %v370_v23 = vmul.f32 %v3432_v12, %v3432_v12  ;;  %v406_v27 = vsel %vm293_vm1, %v369_v16, 0.0 }
  0xe5   :  { %v402_v17 = vsel %vm293_vm1, %v367_v11, 0.0  ;;  %v303_v18 = vsel %vm293_vm1, %v3434_v15, 0.0  ;;  %v368_v19 = vmul.f32 %v3434_v15, %v3434_v15  ;;  %v307_v28 = vsel %vm293_vm1, %v3432_v12, 0.0 }
  0xe6   :  { %v403_v20 = vadd.f32 %v402_v17, %v401_v14  ;;  %v304_v21 = vadd.f32 %v303_v18, %v302_v13  ;;  %v408_v33 = vsel %vm293_vm1, %v370_v23, 0.0 }
  0xe7   :  { %v404_v24 = vsel %vm293_vm1, %v368_v19, 0.0 }
  0xe8   :  { %v306_v25 = vadd.f32 %v305_v22, %v304_v21  ;;  %v405_v26 = vadd.f32 %v404_v24, %v403_v20 }
  0xe9   :  { %v3451_v29 = vpop.f32.mrb[8].mxu0 }
  0xea   :  { %v407_v30 = vadd.f32 %v406_v27, %v405_v26  ;;  %v3453_v31 = vpop.f32.mrb[9].mxu0  ;;  %v308_v32 = vadd.f32 %v307_v28, %v306_v25  ;;  %v373_v40 = vmul.f32 %v3451_v29, %v3451_v29  ;;  %v313_v46 = vsel %vm293_vm1, %v3451_v29, 0.0 }
  0xeb   :  { %v309_v34 = vsel %vm293_vm1, %v3453_v31, 0.0  ;;  %v371_v35 = vmul.f32 %v3453_v31, %v3453_v31  ;;  %v3460_v36 = vpop.f32.mrb[10].mxu0 }
  0xec   :  { %v310_v37 = vadd.f32 %v309_v34, %v308_v32  ;;  %v409_v38 = vadd.f32 %v408_v33, %v407_v30  ;;  %v3462_v39 = vpop.f32.mrb[11].mxu0  ;;  %v374_v47 = vmul.f32 %v3460_v36, %v3460_v36  ;;  %v414_v53 = vsel %vm293_vm1, %v373_v40, 0.0 }
  0xed   :  { %v410_v41 = vsel %vm293_vm1, %v371_v35, 0.0  ;;  %v311_v42 = vsel %vm293_vm1, %v3462_v39, 0.0  ;;  %v372_v43 = vmul.f32 %v3462_v39, %v3462_v39  ;;  %v315_v56 = vsel %vm293_vm1, %v3460_v36, 0.0 }
  0xee   :  { %v411_v44 = vadd.f32 %v410_v41, %v409_v38  ;;  %v312_v45 = vadd.f32 %v311_v42, %v310_v37  ;;  %v416_v61 = vsel %vm293_vm1, %v374_v47, 0.0 }
  0xef   :  { %v412_v48 = vsel %vm293_vm1, %v372_v43, 0.0 }
  0xf0   :  { %v314_v49 = vadd.f32 %v313_v46, %v312_v45  ;;  %v413_v50 = vadd.f32 %v412_v48, %v411_v44 }
  0xf1   :  { %v3479_v57 = vpop.f32.mrb[12].mxu0 }
  0xf2   :  { %v415_v58 = vadd.f32 %v414_v53, %v413_v50  ;;  %v3481_v59 = vpop.f32.mrb[13].mxu0  ;;  %v316_v60 = vadd.f32 %v315_v56, %v314_v49  ;;  %v377_v4 = vmul.f32 %v3479_v57, %v3479_v57  ;;  %v321_v13 = vsel %vm293_vm1, %v3479_v57, 0.0 }
  0xf3   :  { %v317_v62 = vsel %vm293_vm1, %v3481_v59, 0.0  ;;  %v375_v63 = vmul.f32 %v3481_v59, %v3481_v59  ;;  %v3488_v0 = vpop.f32.mrb[14].mxu0 }
  0xf4   :  { %v318_v1 = vadd.f32 %v317_v62, %v316_v60  ;;  %v417_v2 = vadd.f32 %v416_v61, %v415_v58  ;;  %v3490_v3 = vpop.f32.mrb[15].mxu0  ;;  %v378_v14 = vmul.f32 %v3488_v0, %v3488_v0  ;;  %v422_v19 = vsel %vm293_vm1, %v377_v4, 0.0 }
  0xf5   :  { %v418_v6 = vsel %vm293_vm1, %v375_v63, 0.0  ;;  %v319_v8 = vsel %vm293_vm1, %v3490_v3, 0.0  ;;  %v376_v9 = vmul.f32 %v3490_v3, %v3490_v3  ;;  %v323_v20 = vsel %vm293_vm1, %v3488_v0, 0.0 }
  0xf6   :  { %v419_v10 = vadd.f32 %v418_v6, %v417_v2  ;;  %v320_v11 = vadd.f32 %v319_v8, %v318_v1  ;;  %v424_v25 = vsel %vm293_vm1, %v378_v14, 0.0 }
  0xf7   :  { %v420_v16 = vsel %vm293_vm1, %v376_v9, 0.0 }
  0xf8   :  { %v322_v17 = vadd.f32 %v321_v13, %v320_v11  ;;  %v421_v18 = vadd.f32 %v420_v16, %v419_v10 }
  0xf9   :  { %v3507_v21 = vpop.f32.mrb[16].mxu0 }
  0xfa   :  { %v423_v22 = vadd.f32 %v422_v19, %v421_v18  ;;  %v3509_v23 = vpop.f32.mrb[17].mxu0  ;;  %v324_v24 = vadd.f32 %v323_v20, %v322_v17  ;;  %v381_v34 = vmul.f32 %v3507_v21, %v3507_v21  ;;  %v329_v42 = vsel %vm293_vm1, %v3507_v21, 0.0 }
  0xfb   :  { %v325_v26 = vsel %vm293_vm1, %v3509_v23, 0.0  ;;  %v379_v27 = vmul.f32 %v3509_v23, %v3509_v23  ;;  %v3516_v28 = vpop.f32.mrb[18].mxu0 }
  0xfc   :  { %v326_v30 = vadd.f32 %v325_v26, %v324_v24  ;;  %v425_v32 = vadd.f32 %v424_v25, %v423_v22  ;;  %v3518_v33 = vpop.f32.mrb[19].mxu0  ;;  %v382_v43 = vmul.f32 %v3516_v28, %v3516_v28  ;;  %v430_v47 = vsel %vm293_vm1, %v381_v34, 0.0 }
  0xfd   :  { %v426_v35 = vsel %vm293_vm1, %v379_v27, 0.0  ;;  %v327_v37 = vsel %vm293_vm1, %v3518_v33, 0.0  ;;  %v380_v38 = vmul.f32 %v3518_v33, %v3518_v33  ;;  %v331_v48 = vsel %vm293_vm1, %v3516_v28, 0.0 }
  0xfe   :  { %v427_v40 = vadd.f32 %v426_v35, %v425_v32  ;;  %v328_v41 = vadd.f32 %v327_v37, %v326_v30  ;;  %v432_v58 = vsel %vm293_vm1, %v382_v43, 0.0 }
  0xff   :  { %v428_v44 = vsel %vm293_vm1, %v380_v38, 0.0 }
 0x100   :  { %v330_v45 = vadd.f32 %v329_v42, %v328_v41  ;;  %v429_v46 = vadd.f32 %v428_v44, %v427_v40 }
 0x101   :  { %v3535_v49 = vpop.f32.mrb[20].mxu0 }
 0x102   :  { %v431_v50 = vadd.f32 %v430_v47, %v429_v46  ;;  %v3537_v53 = vpop.f32.mrb[21].mxu0  ;;  %v332_v56 = vadd.f32 %v331_v48, %v330_v45  ;;  %v385_v4 = vmul.f32 %v3535_v49, %v3535_v49  ;;  %v337_v13 = vsel %vm293_vm1, %v3535_v49, 0.0 }
 0x103   :  { %v333_v60 = vsel %vm293_vm1, %v3537_v53, 0.0  ;;  %v383_v61 = vmul.f32 %v3537_v53, %v3537_v53  ;;  %v3544_v62 = vpop.f32.mrb[22].mxu0 }
 0x104   :  { %v334_v63 = vadd.f32 %v333_v60, %v332_v56  ;;  %v433_v1 = vadd.f32 %v432_v58, %v431_v50  ;;  %v3546_v2 = vpop.f32.mrb[23].mxu0  ;;  %v386_v14 = vmul.f32 %v3544_v62, %v3544_v62  ;;  %v438_v19 = vsel %vm293_vm1, %v385_v4, 0.0 }
 0x105   :  { %v434_v6 = vsel %vm293_vm1, %v383_v61, 0.0  ;;  %v335_v8 = vsel %vm293_vm1, %v3546_v2, 0.0  ;;  %v384_v9 = vmul.f32 %v3546_v2, %v3546_v2  ;;  %v339_v20 = vsel %vm293_vm1, %v3544_v62, 0.0 }
 0x106   :  { %v435_v10 = vadd.f32 %v434_v6, %v433_v1  ;;  %v336_v11 = vadd.f32 %v335_v8, %v334_v63  ;;  %v440_v27 = vsel %vm293_vm1, %v386_v14, 0.0 }
 0x107   :  { %v436_v16 = vsel %vm293_vm1, %v384_v9, 0.0 }
 0x108   :  { %v338_v17 = vadd.f32 %v337_v13, %v336_v11  ;;  %v437_v18 = vadd.f32 %v436_v16, %v435_v10 }
 0x109   :  { %v3563_v22 = vpop.f32.mrb[24].mxu0 }
 0x10a   :  { %v439_v24 = vadd.f32 %v438_v19, %v437_v18  ;;  %v3565_v25 = vpop.f32.mrb[25].mxu0  ;;  %v340_v26 = vadd.f32 %v339_v20, %v338_v17  ;;  %v389_v40 = vmul.f32 %v3563_v22, %v3563_v22  ;;  %v345_v46 = vsel %vm293_vm1, %v3563_v22, 0.0 }
 0x10b   :  { %v341_v30 = vsel %vm293_vm1, %v3565_v25, 0.0  ;;  %v387_v32 = vmul.f32 %v3565_v25, %v3565_v25  ;;  %v3572_v34 = vpop.f32.mrb[26].mxu0 }
 0x10c   :  { %v342_v35 = vadd.f32 %v341_v30, %v340_v26  ;;  %v441_v37 = vadd.f32 %v440_v27, %v439_v24  ;;  %v3574_v38 = vpop.f32.mrb[27].mxu0  ;;  %v390_v47 = vmul.f32 %v3572_v34, %v3572_v34  ;;  %v446_v58 = vsel %vm293_vm1, %v389_v40, 0.0 }
 0x10d   :  { %v442_v41 = vsel %vm293_vm1, %v387_v32, 0.0  ;;  %v343_v42 = vsel %vm293_vm1, %v3574_v38, 0.0  ;;  %v388_v43 = vmul.f32 %v3574_v38, %v3574_v38  ;;  %v347_v60 = vsel %vm293_vm1, %v3572_v34, 0.0 }
 0x10e   :  { %v443_v44 = vadd.f32 %v442_v41, %v441_v37  ;;  %v344_v45 = vadd.f32 %v343_v42, %v342_v35  ;;  %v448_v6 = vsel %vm293_vm1, %v390_v47, 0.0 }
 0x10f   :  { %v444_v48 = vsel %vm293_vm1, %v388_v43, 0.0 }
 0x110   :  { %v346_v50 = vadd.f32 %v345_v46, %v344_v45  ;;  %v445_v56 = vadd.f32 %v444_v48, %v443_v44 }
 0x111   :  { %v3591_v61 = vpop.f32.mrb[28].mxu0 }
 0x112   :  { %v447_v63 = vadd.f32 %v446_v58, %v445_v56  ;;  %v3593_v1 = vpop.f32.mrb[29].mxu0  ;;  %v348_v4 = vadd.f32 %v347_v60, %v346_v50  ;;  %v393_v16 = vmul.f32 %v3591_v61, %v3591_v61  ;;  %v353_v26 = vsel %vm293_vm1, %v3591_v61, 0.0 }
 0x113   :  { %v349_v8 = vsel %vm293_vm1, %v3593_v1, 0.0  ;;  %v391_v9 = vmul.f32 %v3593_v1, %v3593_v1  ;;  %v3600_v10 = vpop.f32.mrb[30].mxu0 }
 0x114   :  { %v350_v11 = vadd.f32 %v349_v8, %v348_v4  ;;  %v449_v13 = vadd.f32 %v448_v6, %v447_v63  ;;  %v3602_v14 = vpop.f32.mrb[31].mxu0  ;;  %v394_v27 = vmul.f32 %v3600_v10, %v3600_v10  ;;  %v454_v37 = vsel %vm293_vm1, %v393_v16, 0.0 }
 0x115   :  { %v450_v17 = vsel %vm293_vm1, %v391_v9, 0.0  ;;  %v351_v18 = vsel %vm293_vm1, %v3602_v14, 0.0  ;;  %v392_v19 = vmul.f32 %v3602_v14, %v3602_v14  ;;  %v355_v40 = vsel %vm293_vm1, %v3600_v10, 0.0 }
 0x116   :  { %v451_v20 = vadd.f32 %v450_v17, %v449_v13  ;;  %v352_v24 = vadd.f32 %v351_v18, %v350_v11  ;;  %v456_v43 = vsel %vm293_vm1, %v394_v27, 0.0 }
 0x117   :  { %v452_v30 = vsel %vm293_vm1, %v392_v19, 0.0 }
 0x118   :  { %v354_v32 = vadd.f32 %v353_v26, %v352_v24  ;;  %v453_v35 = vadd.f32 %v452_v30, %v451_v20 }
 0x11a   :  { %v356_v41 = vadd.f32 %v355_v40, %v354_v32  ;;  %v455_v42 = vadd.f32 %v454_v37, %v453_v35 }
 0x11c   :  { %v357_v44 = vrot.slane %v356_v41, 4  ;;  %v457_v45 = vadd.f32 %v456_v43, %v455_v42 }
 0x11e   :  { %v358_v46 = vadd.f32 %v357_v44, %v356_v41  ;;  %v458_v47 = vrot.slane %v457_v45, 4 }
 0x120   :  { %v359_v48 = vrot.slane %v358_v46, 2  ;;  %v459_v50 = vadd.f32 %v458_v47, %v457_v45 }
 0x122   :  { %v360_v56 = vadd.f32 %v359_v48, %v358_v46  ;;  %v460_v58 = vrot.slane %v459_v50, 2 }
 0x124   :  { %v361_v60 = vrot.slane %v360_v56, 1  ;;  %v461_v63 = vadd.f32 %v460_v58, %v459_v50 }
 0x126   :  { %v362_v4 = vadd.f32 %v361_v60, %v360_v56  ;;  %v462_v6 = vrot.slane %v461_v63, 1 }
 0x128   :  { %v463_v8 = vadd.f32 %v462_v6, %v461_v63  ;;  %v3620_v9 = vmul.f32 0.00390625, %v362_v4 }
 0x12a   :  { %v465_v11 = vmul.f32 0.00390625, %v463_v8  ;;  %v466_v13 = vmul.f32 %v3620_v9, %v3620_v9  ;;  %v497_v16 = vsub.f32 %v3602_v14, %v3620_v9  ;;  %v468_v17 = vsub.f32 %v3398_v52, %v3620_v9 }
 0x12b   :  { %v469_v18 = vsub.f32 %v3404_v55, %v3620_v9  ;;  %v470_v19 = vsub.f32 %v3396_v51, %v3620_v9  ;;  %v471_v20 = vsub.f32 %v3402_v54, %v3620_v9  ;;  %v472_v24 = vsub.f32 %v3425_v7, %v3620_v9 }
 0x12c   :  { %v467_v26 = vsub.f32 %v465_v11, %v466_v13  ;;  %v473_v27 = vsub.f32 %v3434_v15, %v3620_v9  ;;  %v474_v14 = vsub.f32 %v3423_v5, %v3620_v9  ;;  %v475_v30 = vsub.f32 %v3432_v12, %v3620_v9 }
 0x12d   :  { %v476_v32 = vsub.f32 %v3453_v31, %v3620_v9  ;;  %v477_v51 = vsub.f32 %v3462_v39, %v3620_v9  ;;  %v478_v54 = vsub.f32 %v3451_v29, %v3620_v9  ;;  %v479_v7 = vsub.f32 %v3460_v36, %v3620_v9 }
 0x12e   :  { %v500_v35 = vadd.f32 1e-05, %v467_v26  ;;  %v480_v15 = vsub.f32 %v3481_v59, %v3620_v9  ;;  %v481_v5 = vsub.f32 %v3490_v3, %v3620_v9  ;;  %v482_v12 = vsub.f32 %v3479_v57, %v3620_v9 }
 0x12f   :  { %v483_v31 = vsub.f32 %v3488_v0, %v3620_v9  ;;  %v484_v39 = vsub.f32 %v3509_v23, %v3620_v9  ;;  %v485_v29 = vsub.f32 %v3518_v33, %v3620_v9  ;;  %v486_v36 = vsub.f32 %v3507_v21, %v3620_v9 }
 0x130   :  { %3227 = vrsqrt.f32 %v500_v35  ;;  %v487_v59 = vsub.f32 %v3516_v28, %v3620_v9  ;;  %v488_v3 = vsub.f32 %v3537_v53, %v3620_v9  ;;  %v489_v57 = vsub.f32 %v3546_v2, %v3620_v9 }
 0x131   :  { %v490_v0 = vsub.f32 %v3535_v49, %v3620_v9  ;;  %v491_v23 = vsub.f32 %v3544_v62, %v3620_v9  ;;  %v492_v33 = vsub.f32 %v3565_v25, %v3620_v9  ;;  %v493_v21 = vsub.f32 %v3574_v38, %v3620_v9 }
 0x132   :  { %v494_v28 = vsub.f32 %v3563_v22, %v3620_v9  ;;  %v495_v53 = vsub.f32 %v3572_v34, %v3620_v9  ;;  %v496_v2 = vsub.f32 %v3593_v1, %v3620_v9  ;;  %v498_v49 = vsub.f32 %v3591_v61, %v3620_v9 }
 0x133   :  { %v499_v62 = vsub.f32 %v3600_v10, %v3620_v9 }
 0x13a   :  { %v3228_v37 = vpop.eup %3227 }
 0x13b   :  { %v3688_v25 = vmul.f32 %v3228_v37, %v497_v16  ;;  %v3690_v40 = vmul.f32 %v3228_v37, %v470_v19  ;;  %v3692_v38 = vmul.f32 %v3228_v37, %v471_v20  ;;  %v3694_v22 = vmul.f32 %v3228_v37, %v472_v24 }
 0x13c   :  { %v3696_v41 = vmul.f32 %v3228_v37, %v473_v27  ;;  %v3698_v34 = vmul.f32 %v3228_v37, %v474_v14  ;;  %v3700_v1 = vmul.f32 %v3228_v37, %v475_v30  ;;  %v3702_v42 = vmul.f32 %v3228_v37, %v476_v32 }
 0x13d   :  { %v3705_v61 = vmul.f32 0.01, %v3688_v25  ;;  %v3707_v10 = vmul.f32 %v3228_v37, %v477_v51  ;;  %v3709_v43 = vmul.f32 %v3228_v37, %v478_v54  ;;  %v3711_v44 = vmul.f32 %v3228_v37, %v479_v7 }
 0x13e   :  { %v3713_v45 = vmul.f32 %v3228_v37, %v480_v15  ;;  %v3715_v46 = vmul.f32 %v3228_v37, %v481_v5  ;;  %v3717_v47 = vmul.f32 %v3228_v37, %v482_v12  ;;  %v3719_v48 = vmul.f32 %v3228_v37, %v483_v31 }
 0x13f   :  { %5383 = vst [vmem:[#allocation2_spill] sm:$0xff] %v3705_v61  ;;  %v3723_v56 = vmul.f32 %v3228_v37, %v484_v39  ;;  %v3725_v58 = vmul.f32 %v3228_v37, %v485_v29  ;;  %v3727_v60 = vmul.f32 %v3228_v37, %v486_v36  ;;  %v3729_v63 = vmul.f32 %v3228_v37, %v487_v59 }
 0x140   :  { %v3731_v4 = vmul.f32 %v3228_v37, %v488_v3  ;;  %v3733_v6 = vmul.f32 %v3228_v37, %v489_v57  ;;  %v3735_v8 = vmul.f32 %v3228_v37, %v490_v0  ;;  %v3737_v11 = vmul.f32 %v3228_v37, %v491_v23 }
 0x141   :  { %v3739_v13 = vmul.f32 %v3228_v37, %v492_v33  ;;  %v3741_v16 = vmul.f32 %v3228_v37, %v493_v21  ;;  %v3743_v19 = vmul.f32 %v3228_v37, %v494_v28  ;;  %v3745_v20 = vmul.f32 %v3228_v37, %v495_v53 }
 0x142   :  { %v3747_v24 = vmul.f32 %v3228_v37, %v496_v2  ;;  %v3749_v26 = vmul.f32 %v3228_v37, %v498_v49  ;;  %v3751_v27 = vmul.f32 %v3228_v37, %v499_v62  ;;  %v3754_v14 = vmul.f32 0.01, %v3690_v40 }
 0x143   :  { %v537_v30 = vmul.f32 0.01, %v3692_v38  ;;  %v538_v32 = vmul.f32 0.01, %v3694_v22  ;;  %v3761_v51 = vmul.f32 %v3228_v37, %v468_v17  ;;  %v539_v54 = vmul.f32 0.01, %v3696_v41 }
 0x144   :  { %v540_v7 = vmul.f32 0.01, %v3698_v34  ;;  %v541_v35 = vmul.f32 0.01, %v3700_v1  ;;  %v3769_v15 = vmul.f32 %v3228_v37, %v469_v18  ;;  %v542_v5 = vmul.f32 0.01, %v3702_v42 }
 0x145   :  { %v543_v12 = vmul.f32 0.01, %v3707_v10  ;;  %v544_v31 = vmul.f32 0.01, %v3709_v43  ;;  %v568_v52 = vmax.f32 %v3690_v40, %v3754_v14  ;;  %v545_v17 = vmul.f32 0.01, %v3711_v44 }
 0x146   :  { %v546_v39 = vmul.f32 0.01, %v3713_v45  ;;  %v547_v29 = vmul.f32 0.01, %v3715_v46  ;;  %v569_v36 = vmax.f32 %v3692_v38, %v537_v30  ;;  %v548_v55 = vmul.f32 0.01, %v3717_v47 }
 0x147   :  { %v549_v9 = vmul.f32 0.01, %v3719_v48  ;;  %v550_v18 = vmul.f32 0.01, %v3723_v56  ;;  %v570_v59 = vmax.f32 %v3694_v22, %v538_v32  ;;  %v551_v3 = vmul.f32 0.01, %v3725_v58 }
 0x148   :  { %v552_v57 = vmul.f32 0.01, %v3727_v60  ;;  %v553_v0 = vmul.f32 0.01, %v3729_v63  ;;  %v571_v23 = vmax.f32 %v3696_v41, %v539_v54  ;;  %v554_v33 = vmul.f32 0.01, %v3731_v4 }
 0x149   :  { %v555_v21 = vmul.f32 0.01, %v3733_v6  ;;  %v556_v28 = vmul.f32 0.01, %v3735_v8  ;;  %v572_v53 = vmax.f32 %v3698_v34, %v540_v7  ;;  %v557_v2 = vmul.f32 0.01, %v3737_v11 }
 0x14a   :  { %v558_v49 = vmul.f32 0.01, %v3739_v13  ;;  %v559_v62 = vmul.f32 0.01, %v3741_v16  ;;  %v573_v37 = vmax.f32 %v3700_v1, %v541_v35  ;;  %v560_v40 = vmul.f32 0.01, %v3743_v19 }
 0x14b   :  { %v561_v38 = vmul.f32 0.01, %v3745_v20  ;;  %v562_v22 = vmul.f32 0.01, %v3747_v24  ;;  %v574_v41 = vmax.f32 %v3702_v42, %v542_v5  ;;  %v564_v14 = vmul.f32 0.01, %v3749_v26 }
 0x14c   :  { %v565_v34 = vmul.f32 0.01, %v3751_v27  ;;  %v575_v30 = vmax.f32 %v3707_v10, %v543_v12  ;;  %v576_v32 = vmax.f32 %v3709_v43, %v544_v31  ;;  %v577_v54 = vmax.f32 %v3711_v44, %v545_v17 }
 0x14d   :  { %v578_v1 = vmax.f32 %v3713_v45, %v546_v39  ;;  %v579_v7 = vmax.f32 %v3715_v46, %v547_v29  ;;  %v580_v35 = vmax.f32 %v3717_v47, %v548_v55  ;;  %v581_v50 = vmax.f32 %v3719_v48, %v549_v9 }
 0x14e   :  { %v582_v42 = vmax.f32 %v3723_v56, %v550_v18  ;;  %v583_v5 = vmax.f32 %v3725_v58, %v551_v3  ;;  %v584_v61 = vmax.f32 %v3727_v60, %v552_v57  ;;  %v585_v10 = vmax.f32 %v3729_v63, %v553_v0  ;;  %v5384_v3 = vld [vmem:[#allocation2_spill] sm:$0xff] }
 0x14f   :  { %v586_v43 = vmax.f32 %v3731_v4, %v554_v33  ;;  %v587_v44 = vmax.f32 %v3733_v6, %v555_v21  ;;  %v588_v45 = vmax.f32 %v3735_v8, %v556_v28  ;;  %v589_v46 = vmax.f32 %v3737_v11, %v557_v2 }
 0x150   :  { %v590_v47 = vmax.f32 %v3739_v13, %v558_v49  ;;  %v591_v48 = vmax.f32 %v3741_v16, %v559_v62  ;;  %v592_v56 = vmax.f32 %v3743_v19, %v560_v40  ;;  %v593_v58 = vmax.f32 %v3745_v20, %v561_v38 }
 0x151   :  { %v594_v60 = vmax.f32 %v3747_v24, %v562_v22  ;;  %v596_v63 = vmax.f32 %v3749_v26, %v564_v14  ;;  %v597_v4 = vmax.f32 %v3751_v27, %v565_v34  ;;  %v534_v6 = vmul.f32 0.01, %v3761_v51 }
 0x152   :  { %v535_v8 = vmul.f32 0.01, %v3769_v15  ;;  %v599_v12 = vpack.c.bf16 %v569_v36, %v568_v52  ;;  %v600_v11 = vpack.c.bf16 %v571_v23, %v570_v59  ;;  %v601_v31 = vpack.c.bf16 %v573_v37, %v572_v53 }
 0x153   :  { %v602_v13 = vpack.c.bf16 %v575_v30, %v574_v41  ;;  %v603_v17 = vpack.c.bf16 %v577_v54, %v576_v32  ;;  %v604_v16 = vpack.c.bf16 %v579_v7, %v578_v1  ;;  %v566_v19 = vmax.f32 %v3761_v51, %v534_v6  ;;  %v3220_v51 = vld [vmem:[%s5371_s3 + $0x18] sm:$0xff]  }
 0x154   :  { %v567_v20 = vmax.f32 %v3769_v15, %v535_v8  ;;  %v605_v39 = vpack.c.bf16 %v581_v50, %v580_v35  ;;  %v606_v24 = vpack.c.bf16 %v583_v5, %v582_v42  ;;  %v607_v29 = vpack.c.bf16 %v585_v10, %v584_v61  ;;  %v3218_v61 = vld [vmem:[%s5371_s3 + $0x8] sm:$0xff]   ;;  %v3219_v50 = vld [vmem:[%s5371_s3 + $0x10] sm:$0xff]  }
 0x155   :  { %v608_v26 = vpack.c.bf16 %v587_v44, %v586_v43  ;;  %v609_v55 = vpack.c.bf16 %v589_v46, %v588_v45  ;;  %v610_v27 = vpack.c.bf16 %v591_v48, %v590_v47  ;;  %v611_v18 = vpack.c.bf16 %v593_v58, %v592_v56 }
 0x156   :  { %v598_v9 = vpack.c.bf16 %v567_v20, %v566_v19  ;;  %v5385_v52 = vmax.f32 %v3688_v25, %v5384_v3  ;;  %v613_v59 = vpack.c.bf16 %v597_v4, %v596_v63  ;;  %v3217_v25 = vld [vmem:[%s5371_s3] sm:$0xff]  }
 0x157   :  { %3063 = vmatprep.subr.bf16.mxu0 %v3217_v25 }
 0x158   :  { %v612_v36 = vpack.c.bf16 %v5385_v52, %v594_v60  ;;  %3031 = vmatprep.mubr.msk.bf16.mxu1 %vm293_vm1, %v598_v9  ;;  %3064 = vmatpush3.bf16.msra.mxu0 %v3217_v25 }
 0x159   :  { %3032 = vmatmul.mubr.msk.bf16.vlgmr.msra.gmra.mrb[0].mxu1 %vm293_vm1, %v599_v12  ;;  %3065 = vmatprep.subr.bf16.mxu0 %v3218_v61 }
 0x15a   :  { %3035 = vmatprep.mubr.msk.bf16.mxu1 %vm293_vm1, %v600_v11 }
 0x15c   :  { %3066 = vmatpush3.bf16.msra.mxu0 %v3218_v61 }
 0x15d   :  { %3067 = vmatprep.subr.bf16.mxu0 %v3219_v50 }
 0x160   :  { %3068 = vmatpush3.bf16.msra.mxu0 %v3219_v50 }
 0x161   :  { %3036 = vmatmul.mubr.msk.bf16.gmra.mrb[4].mxu1 %vm293_vm1, %v601_v31  ;;  %3069 = vmatprep.subr.bf16.mxu0 %v3220_v51 }
 0x162   :  { %3039 = vmatprep.mubr.msk.bf16.mxu1 %vm293_vm1, %v602_v13 }
 0x164   :  { %3070 = vmatpush3.bf16.msra.mxu0 %v3220_v51 }
 0x169   :  { %3040 = vmatmul.mubr.msk.bf16.gmra.mrb[8].mxu1 %vm293_vm1, %v603_v17 }
 0x16a   :  { %3043 = vmatprep.mubr.msk.bf16.mxu1 %vm293_vm1, %v604_v16 }
 0x171   :  { %3044 = vmatmul.mubr.msk.bf16.gmra.mrb[12].mxu1 %vm293_vm1, %v605_v39 }
 0x172   :  { %3047 = vmatprep.mubr.msk.bf16.mxu1 %vm293_vm1, %v606_v24 }
 0x179   :  { %3048 = vmatmul.mubr.msk.bf16.gmra.mrb[16].mxu1 %vm293_vm1, %v607_v29 }
 0x17a   :  { %3051 = vmatprep.mubr.msk.bf16.mxu1 %vm293_vm1, %v608_v26 }
 0x181   :  { %3052 = vmatmul.mubr.msk.bf16.gmra.mrb[20].mxu1 %vm293_vm1, %v609_v55 }
 0x182   :  { %3055 = vmatprep.mubr.msk.bf16.mxu1 %vm293_vm1, %v610_v27 }
 0x189   :  { %3056 = vmatmul.mubr.msk.bf16.gmra.mrb[24].mxu1 %vm293_vm1, %v611_v18 }
 0x18a   :  { %3059 = vmatprep.mubr.msk.bf16.mxu1 %vm293_vm1, %v612_v36 }
 0x191   :  { %3060 = vmatmul.mubr.msk.bf16.gmra.mrb[28].mxu1 %vm293_vm1, %v613_v59 }
 0x22c   :  { %v3859_v15 = vpop.f32.mrb[0].mxu1 }
 0x22d   :  { %v3861_v57 = vpop.f32.mrb[1].mxu1  ;;  %v911_v21 = vmul.f32 %v3859_v15, %v3859_v15  ;;  %v843_v62 = vsel %vm839_vm2, %v3859_v15, 0.0 }
 0x22e   :  { %v909_v0 = vmul.f32 %v3861_v57, %v3861_v57  ;;  %v3865_v23 = vpop.f32.mrb[2].mxu1  ;;  %v840_v28 = vsel %vm839_vm2, %v3861_v57, 0.0 }
 0x22f   :  { %v3867_v33 = vpop.f32.mrb[3].mxu1  ;;  %v912_v40 = vmul.f32 %v3865_v23, %v3865_v23  ;;  %v944_v14 = vsel %vm839_vm2, %v911_v21, 0.0  ;;  %v845_v34 = vsel %vm839_vm2, %v3865_v23, 0.0 }
 0x230   :  { %v841_v53 = vsel %vm839_vm2, %v3867_v33, 0.0  ;;  %v910_v2 = vmul.f32 %v3867_v33, %v3867_v33  ;;  %v941_v37 = vsel %vm839_vm2, %v909_v0, 0.0 }
 0x231   :  { %v842_v49 = vadd.f32 %v841_v53, %v840_v28  ;;  %v946_v7 = vsel %vm839_vm2, %v912_v40, 0.0 }
 0x232   :  { %v942_v38 = vsel %vm839_vm2, %v910_v2, 0.0 }
 0x233   :  { %v844_v22 = vadd.f32 %v843_v62, %v842_v49  ;;  %v943_v41 = vadd.f32 %v942_v38, %v941_v37 }
 0x234   :  { %v3886_v30 = vpop.f32.mrb[4].mxu1 }
 0x235   :  { %v945_v32 = vadd.f32 %v944_v14, %v943_v41  ;;  %v3888_v54 = vpop.f32.mrb[5].mxu1  ;;  %v846_v1 = vadd.f32 %v845_v34, %v844_v22  ;;  %v915_v45 = vmul.f32 %v3886_v30, %v3886_v30  ;;  %v851_v60 = vsel %vm839_vm2, %v3886_v30, 0.0 }
 0x236   :  { %v847_v35 = vsel %vm839_vm2, %v3888_v54, 0.0  ;;  %v913_v42 = vmul.f32 %v3888_v54, %v3888_v54  ;;  %v3895_v5 = vpop.f32.mrb[6].mxu1 }
 0x237   :  { %v848_v10 = vadd.f32 %v847_v35, %v846_v1  ;;  %v947_v43 = vadd.f32 %v946_v7, %v945_v32  ;;  %v3897_v44 = vpop.f32.mrb[7].mxu1  ;;  %v916_v63 = vmul.f32 %v3895_v5, %v3895_v5  ;;  %v952_v12 = vsel %vm839_vm2, %v915_v45, 0.0 }
 0x238   :  { %v948_v46 = vsel %vm839_vm2, %v913_v42, 0.0  ;;  %v849_v47 = vsel %vm839_vm2, %v3897_v44, 0.0  ;;  %v914_v48 = vmul.f32 %v3897_v44, %v3897_v44  ;;  %v853_v11 = vsel %vm839_vm2, %v3895_v5, 0.0 }
 0x239   :  { %v949_v56 = vadd.f32 %v948_v46, %v947_v43  ;;  %v850_v58 = vadd.f32 %v849_v47, %v848_v10  ;;  %v954_v19 = vsel %vm839_vm2, %v916_v63, 0.0 }
 0x23a   :  { %v950_v4 = vsel %vm839_vm2, %v914_v48, 0.0 }
 0x23b   :  { %v852_v6 = vadd.f32 %v851_v60, %v850_v58  ;;  %v951_v8 = vadd.f32 %v950_v4, %v949_v56 }
 0x23c   :  { %v3914_v31 = vpop.f32.mrb[8].mxu1 }
 0x23d   :  { %v953_v13 = vadd.f32 %v952_v12, %v951_v8  ;;  %v3916_v17 = vpop.f32.mrb[9].mxu1  ;;  %v854_v16 = vadd.f32 %v853_v11, %v852_v6  ;;  %v919_v27 = vmul.f32 %v3914_v31, %v3914_v31  ;;  %v859_v59 = vsel %vm839_vm2, %v3914_v31, 0.0 }
 0x23e   :  { %v855_v20 = vsel %vm839_vm2, %v3916_v17, 0.0  ;;  %v917_v39 = vmul.f32 %v3916_v17, %v3916_v17  ;;  %v3923_v24 = vpop.f32.mrb[10].mxu1 }
 0x23f   :  { %v856_v29 = vadd.f32 %v855_v20, %v854_v16  ;;  %v955_v26 = vadd.f32 %v954_v19, %v953_v13  ;;  %v3925_v55 = vpop.f32.mrb[11].mxu1  ;;  %v920_v25 = vmul.f32 %v3923_v24, %v3923_v24  ;;  %v960_v0 = vsel %vm839_vm2, %v919_v27, 0.0 }
 0x240   :  { %v956_v9 = vsel %vm839_vm2, %v917_v39, 0.0  ;;  %v857_v18 = vsel %vm839_vm2, %v3925_v55, 0.0  ;;  %v918_v3 = vmul.f32 %v3925_v55, %v3925_v55  ;;  %v861_v21 = vsel %vm839_vm2, %v3923_v24, 0.0 }
 0x241   :  { %v957_v52 = vadd.f32 %v956_v9, %v955_v26  ;;  %v858_v36 = vadd.f32 %v857_v18, %v856_v29  ;;  %v962_v62 = vsel %vm839_vm2, %v920_v25, 0.0 }
 0x242   :  { %v958_v61 = vsel %vm839_vm2, %v918_v3, 0.0 }
 0x243   :  { %v860_v50 = vadd.f32 %v859_v59, %v858_v36  ;;  %v959_v51 = vadd.f32 %v958_v61, %v957_v52 }
 0x244   :  { %v3942_v28 = vpop.f32.mrb[12].mxu1 }
 0x245   :  { %v961_v53 = vadd.f32 %v960_v0, %v959_v51  ;;  %v3944_v2 = vpop.f32.mrb[13].mxu1  ;;  %v862_v49 = vadd.f32 %v861_v21, %v860_v50  ;;  %v923_v34 = vmul.f32 %v3942_v28, %v3942_v28  ;;  %v867_v10 = vsel %vm839_vm2, %v3942_v28, 0.0 }
 0x246   :  { %v863_v37 = vsel %vm839_vm2, %v3944_v2, 0.0  ;;  %v921_v40 = vmul.f32 %v3944_v2, %v3944_v2  ;;  %v3951_v38 = vpop.f32.mrb[14].mxu1 }
 0x247   :  { %v864_v22 = vadd.f32 %v863_v37, %v862_v49  ;;  %v963_v41 = vadd.f32 %v962_v62, %v961_v53  ;;  %v3953_v14 = vpop.f32.mrb[15].mxu1  ;;  %v924_v43 = vmul.f32 %v3951_v38, %v3951_v38  ;;  %v968_v48 = vsel %vm839_vm2, %v923_v34, 0.0 }
 0x248   :  { %v964_v32 = vsel %vm839_vm2, %v921_v40, 0.0  ;;  %v865_v1 = vsel %vm839_vm2, %v3953_v14, 0.0  ;;  %v922_v7 = vmul.f32 %v3953_v14, %v3953_v14  ;;  %v869_v56 = vsel %vm839_vm2, %v3951_v38, 0.0 }
 0x249   :  { %v965_v35 = vadd.f32 %v964_v32, %v963_v41  ;;  %v866_v42 = vadd.f32 %v865_v1, %v864_v22  ;;  %v970_v6 = vsel %vm839_vm2, %v924_v43, 0.0 }
 0x24a   :  { %v966_v45 = vsel %vm839_vm2, %v922_v7, 0.0 }
 0x24b   :  { %v868_v46 = vadd.f32 %v867_v10, %v866_v42  ;;  %v967_v47 = vadd.f32 %v966_v45, %v965_v35 }
 0x24c   :  { %v3970_v58 = vpop.f32.mrb[16].mxu1 }
 0x24d   :  { %v969_v60 = vadd.f32 %v968_v48, %v967_v47  ;;  %v3972_v63 = vpop.f32.mrb[17].mxu1  ;;  %v870_v4 = vadd.f32 %v869_v56, %v868_v46  ;;  %v927_v20 = vmul.f32 %v3970_v58, %v3970_v58  ;;  %v875_v18 = vsel %vm839_vm2, %v3970_v58, 0.0 }
 0x24e   :  { %v871_v8 = vsel %vm839_vm2, %v3972_v63, 0.0  ;;  %v925_v12 = vmul.f32 %v3972_v63, %v3972_v63  ;;  %v3979_v11 = vpop.f32.mrb[18].mxu1 }
 0x24f   :  { %v872_v13 = vadd.f32 %v871_v8, %v870_v4  ;;  %v971_v16 = vadd.f32 %v970_v6, %v969_v60  ;;  %v3981_v19 = vpop.f32.mrb[19].mxu1  ;;  %v928_v3 = vmul.f32 %v3979_v11, %v3979_v11  ;;  %v976_v25 = vsel %vm839_vm2, %v927_v20, 0.0 }
 0x250   :  { %v972_v39 = vsel %vm839_vm2, %v925_v12, 0.0  ;;  %v873_v29 = vsel %vm839_vm2, %v3981_v19, 0.0  ;;  %v926_v26 = vmul.f32 %v3981_v19, %v3981_v19  ;;  %v877_v61 = vsel %vm839_vm2, %v3979_v11, 0.0 }
 0x251   :  { %v973_v27 = vadd.f32 %v972_v39, %v971_v16  ;;  %v874_v9 = vadd.f32 %v873_v29, %v872_v13  ;;  %v978_v53 = vsel %vm839_vm2, %v928_v3, 0.0 }
 0x252   :  { %v974_v52 = vsel %vm839_vm2, %v926_v26, 0.0 }
 0x253   :  { %v876_v36 = vadd.f32 %v875_v18, %v874_v9  ;;  %v975_v59 = vadd.f32 %v974_v52, %v973_v27 }
 0x254   :  { %v3998_v50 = vpop.f32.mrb[20].mxu1 }
 0x255   :  { %v977_v51 = vadd.f32 %v976_v25, %v975_v59  ;;  %v4000_v0 = vpop.f32.mrb[21].mxu1  ;;  %v878_v21 = vadd.f32 %v877_v61, %v876_v36  ;;  %v931_v34 = vmul.f32 %v3998_v50, %v3998_v50  ;;  %v883_v10 = vsel %vm839_vm2, %v3998_v50, 0.0 }
 0x256   :  { %v879_v49 = vsel %vm839_vm2, %v4000_v0, 0.0  ;;  %v929_v62 = vmul.f32 %v4000_v0, %v4000_v0  ;;  %v4007_v37 = vpop.f32.mrb[22].mxu1 }
 0x257   :  { %v880_v40 = vadd.f32 %v879_v49, %v878_v21  ;;  %v979_v22 = vadd.f32 %v978_v53, %v977_v51  ;;  %v4009_v41 = vpop.f32.mrb[23].mxu1  ;;  %v932_v43 = vmul.f32 %v4007_v37, %v4007_v37  ;;  %v984_v48 = vsel %vm839_vm2, %v931_v34, 0.0  ;;  %v1417_v51 = vld [vmem:[%s5372_s4] sm:$0xf] }
 0x258   :  { %v980_v32 = vsel %vm839_vm2, %v929_v62, 0.0  ;;  %v881_v1 = vsel %vm839_vm2, %v4009_v41, 0.0  ;;  %v930_v7 = vmul.f32 %v4009_v41, %v4009_v41  ;;  %v885_v56 = vsel %vm839_vm2, %v4007_v37, 0.0  ;;  %3213 = vmatprep.subr.msk.bf16.mxu1 %vm1467_vm3, %v1417_v51 }
 0x259   :  { %v981_v35 = vadd.f32 %v980_v32, %v979_v22  ;;  %v882_v42 = vadd.f32 %v881_v1, %v880_v40  ;;  %v986_v12 = vsel %vm839_vm2, %v932_v43, 0.0  ;;  %v1469_v49 = vsel %vm1467_vm3, %v1417_v51, 0 }
 0x25a   :  { %v982_v45 = vsel %vm839_vm2, %v930_v7, 0.0  ;;  %3104 = vmatpush3.bf16.msra.mxu1 %v1469_v49 }
 0x25b   :  { %v884_v46 = vadd.f32 %v883_v10, %v882_v42  ;;  %v983_v47 = vadd.f32 %v982_v45, %v981_v35 }
 0x25c   :  { %v4026_v60 = vpop.f32.mrb[24].mxu1 }
 0x25d   :  { %v985_v4 = vadd.f32 %v984_v48, %v983_v47  ;;  %v4028_v6 = vpop.f32.mrb[25].mxu1  ;;  %v886_v8 = vadd.f32 %v885_v56, %v884_v46  ;;  %v935_v27 = vmul.f32 %v4026_v60, %v4026_v60  ;;  %v891_v59 = vsel %vm839_vm2, %v4026_v60, 0.0 }
 0x25e   :  { %v887_v13 = vsel %vm839_vm2, %v4028_v6, 0.0  ;;  %v933_v16 = vmul.f32 %v4028_v6, %v4028_v6  ;;  %v4035_v20 = vpop.f32.mrb[26].mxu1 }
 0x25f   :  { %v888_v39 = vadd.f32 %v887_v13, %v886_v8  ;;  %v987_v29 = vadd.f32 %v986_v12, %v985_v4  ;;  %v4037_v26 = vpop.f32.mrb[27].mxu1  ;;  %v936_v25 = vmul.f32 %v4035_v20, %v4035_v20  ;;  %v992_v62 = vsel %vm839_vm2, %v935_v27, 0.0 }
 0x260   :  { %v988_v9 = vsel %vm839_vm2, %v933_v16, 0.0  ;;  %v889_v18 = vsel %vm839_vm2, %v4037_v26, 0.0  ;;  %v934_v3 = vmul.f32 %v4037_v26, %v4037_v26  ;;  %v893_v40 = vsel %vm839_vm2, %v4035_v20, 0.0 }
 0x261   :  { %v989_v52 = vadd.f32 %v988_v9, %v987_v29  ;;  %v890_v36 = vadd.f32 %v889_v18, %v888_v39  ;;  %v994_v7 = vsel %vm839_vm2, %v936_v25, 0.0 }
 0x262   :  { %v990_v61 = vsel %vm839_vm2, %v934_v3, 0.0 }
 0x263   :  { %v892_v21 = vadd.f32 %v891_v59, %v890_v36  ;;  %v991_v53 = vadd.f32 %v990_v61, %v989_v52 }
 0x264   :  { %v4057_v22 = vpop.f32.mrb[28].mxu1 }
 0x265   :  { %v993_v34 = vadd.f32 %v992_v62, %v991_v53  ;;  %v4059_v32 = vpop.f32.mrb[29].mxu1  ;;  %v894_v1 = vadd.f32 %v893_v40, %v892_v21  ;;  %v939_v47 = vmul.f32 %v4057_v22, %v4057_v22  ;;  %v899_v13 = vsel %vm839_vm2, %v4057_v22, 0.0 }
 0x266   :  { %v895_v35 = vsel %vm839_vm2, %v4059_v32, 0.0  ;;  %v937_v42 = vmul.f32 %v4059_v32, %v4059_v32  ;;  %v4066_v10 = vpop.f32.mrb[30].mxu1 }
 0x267   :  { %v896_v43 = vadd.f32 %v895_v35, %v894_v1  ;;  %v995_v45 = vadd.f32 %v994_v7, %v993_v34  ;;  %v4068_v46 = vpop.f32.mrb[31].mxu1  ;;  %v940_v16 = vmul.f32 %v4066_v10, %v4066_v10  ;;  %v1000_v9 = vsel %vm839_vm2, %v939_v47, 0.0 }
 0x268   :  { %v996_v48 = vsel %vm839_vm2, %v937_v42, 0.0  ;;  %v897_v56 = vsel %vm839_vm2, %v4068_v46, 0.0  ;;  %v938_v4 = vmul.f32 %v4068_v46, %v4068_v46  ;;  %v901_v18 = vsel %vm839_vm2, %v4066_v10, 0.0 }
 0x269   :  { %v997_v8 = vadd.f32 %v996_v48, %v995_v45  ;;  %v898_v12 = vadd.f32 %v897_v56, %v896_v43  ;;  %v1002_v36 = vsel %vm839_vm2, %v940_v16, 0.0 }
 0x26a   :  { %v998_v39 = vsel %vm839_vm2, %v938_v4, 0.0 }
 0x26b   :  { %v900_v29 = vadd.f32 %v899_v13, %v898_v12  ;;  %v999_v27 = vadd.f32 %v998_v39, %v997_v8 }
 0x26d   :  { %v902_v3 = vadd.f32 %v901_v18, %v900_v29  ;;  %v1001_v52 = vadd.f32 %v1000_v9, %v999_v27 }
 0x26f   :  { %v903_v59 = vrot.slane %v902_v3, 4  ;;  %v1003_v25 = vadd.f32 %v1002_v36, %v1001_v52 }
 0x271   :  { %v904_v61 = vadd.f32 %v903_v59, %v902_v3  ;;  %v1004_v51 = vrot.slane %v1003_v25, 4 }
 0x273   :  { %v905_v21 = vrot.slane %v904_v61, 2  ;;  %v1005_v53 = vadd.f32 %v1004_v51, %v1003_v25 }
 0x275   :  { %v906_v49 = vadd.f32 %v905_v21, %v904_v61  ;;  %v1006_v62 = vrot.slane %v1005_v53, 2 }
 0x277   :  { %v907_v40 = vrot.slane %v906_v49, 1  ;;  %v1007_v34 = vadd.f32 %v1006_v62, %v1005_v53 }
 0x279   :  { %v908_v1 = vadd.f32 %v907_v40, %v906_v49  ;;  %v1008_v7 = vrot.slane %v1007_v34, 1 }
 0x27b   :  { %v1009_v35 = vadd.f32 %v1008_v7, %v1007_v34  ;;  %v4086_v42 = vmul.f32 0.00390625, %v908_v1 }
 0x27d   :  { %v1011_v43 = vmul.f32 0.00390625, %v1009_v35  ;;  %v1012_v45 = vmul.f32 %v4086_v42, %v4086_v42  ;;  %v1043_v47 = vsub.f32 %v4068_v46, %v4086_v42  ;;  %v1014_v48 = vsub.f32 %v3861_v57, %v4086_v42 }
 0x27e   :  { %v1015_v56 = vsub.f32 %v3867_v33, %v4086_v42  ;;  %v1016_v4 = vsub.f32 %v3859_v15, %v4086_v42  ;;  %v1017_v8 = vsub.f32 %v3865_v23, %v4086_v42  ;;  %v1018_v12 = vsub.f32 %v3888_v54, %v4086_v42 }
 0x27f   :  { %v1013_v13 = vsub.f32 %v1011_v43, %v1012_v45  ;;  %v1019_v16 = vsub.f32 %v3897_v44, %v4086_v42  ;;  %v1020_v46 = vsub.f32 %v3886_v30, %v4086_v42  ;;  %v1021_v57 = vsub.f32 %v3895_v5, %v4086_v42 }
 0x280   :  { %v1022_v33 = vsub.f32 %v3916_v17, %v4086_v42  ;;  %v1023_v15 = vsub.f32 %v3925_v55, %v4086_v42  ;;  %v1024_v23 = vsub.f32 %v3914_v31, %v4086_v42  ;;  %v1025_v54 = vsub.f32 %v3923_v24, %v4086_v42 }
 0x281   :  { %v1046_v39 = vadd.f32 1e-05, %v1013_v13  ;;  %v1026_v44 = vsub.f32 %v3944_v2, %v4086_v42  ;;  %v1027_v30 = vsub.f32 %v3953_v14, %v4086_v42  ;;  %v1028_v5 = vsub.f32 %v3942_v28, %v4086_v42 }
 0x282   :  { %v1029_v17 = vsub.f32 %v3951_v38, %v4086_v42  ;;  %v1030_v55 = vsub.f32 %v3972_v63, %v4086_v42  ;;  %v1031_v31 = vsub.f32 %v3981_v19, %v4086_v42  ;;  %v1032_v24 = vsub.f32 %v3970_v58, %v4086_v42 }
 0x283   :  { %3229 = vrsqrt.f32 %v1046_v39  ;;  %v1033_v2 = vsub.f32 %v3979_v11, %v4086_v42  ;;  %v1034_v14 = vsub.f32 %v4000_v0, %v4086_v42  ;;  %v1035_v28 = vsub.f32 %v4009_v41, %v4086_v42 }
 0x284   :  { %v1036_v38 = vsub.f32 %v3998_v50, %v4086_v42  ;;  %v1037_v63 = vsub.f32 %v4007_v37, %v4086_v42  ;;  %v1038_v19 = vsub.f32 %v4028_v6, %v4086_v42  ;;  %v1039_v58 = vsub.f32 %v4037_v26, %v4086_v42 }
 0x285   :  { %v1040_v11 = vsub.f32 %v4026_v60, %v4086_v42  ;;  %v1041_v0 = vsub.f32 %v4035_v20, %v4086_v42  ;;  %v1042_v41 = vsub.f32 %v4059_v32, %v4086_v42  ;;  %v1044_v50 = vsub.f32 %v4057_v22, %v4086_v42 }
 0x286   :  { %v1045_v37 = vsub.f32 %v4066_v10, %v4086_v42 }
 0x28d   :  { %v3230_v29 = vpop.eup %3229 }
 0x28e   :  { %v4154_v6 = vmul.f32 %v3230_v29, %v1043_v47  ;;  %v4156_v27 = vmul.f32 %v3230_v29, %v1014_v48  ;;  %v4158_v26 = vmul.f32 %v3230_v29, %v1015_v56  ;;  %v4160_v60 = vmul.f32 %v3230_v29, %v1016_v4 }
 0x28f   :  { %v4162_v9 = vmul.f32 %v3230_v29, %v1017_v8  ;;  %v4164_v20 = vmul.f32 %v3230_v29, %v1018_v12  ;;  %v4166_v32 = vmul.f32 %v3230_v29, %v1019_v16  ;;  %v4168_v18 = vmul.f32 %v3230_v29, %v1020_v46 }
 0x290   :  { %5386 = vst [vmem:[#allocation2_spill] sm:$0xff] %v4154_v6  ;;  %v4170_v22 = vmul.f32 %v3230_v29, %v1021_v57  ;;  %v4172_v10 = vmul.f32 %v3230_v29, %v1022_v33  ;;  %v4174_v3 = vmul.f32 %v3230_v29, %v1023_v15  ;;  %v4176_v52 = vmul.f32 %v3230_v29, %v1024_v23 }
 0x291   :  { %v4178_v36 = vmul.f32 %v3230_v29, %v1025_v54  ;;  %v4180_v59 = vmul.f32 %v3230_v29, %v1026_v44  ;;  %v4182_v25 = vmul.f32 %v3230_v29, %v1027_v30  ;;  %v4185_v61 = vmul.f32 0.01, %v4154_v6 }
 0x292   :  { %v4187_v51 = vmul.f32 %v3230_v29, %v1028_v5  ;;  %v4189_v21 = vmul.f32 %v3230_v29, %v1029_v17  ;;  %v4191_v53 = vmul.f32 %v3230_v29, %v1030_v55  ;;  %v4193_v49 = vmul.f32 %v3230_v29, %v1031_v31 }
 0x293   :  { %5387 = vst [vmem:[#allocation3_spill] sm:$0xff] %v4185_v61  ;;  %v4195_v62 = vmul.f32 %v3230_v29, %v1032_v24  ;;  %v4197_v40 = vmul.f32 %v3230_v29, %v1033_v2  ;;  %v4199_v34 = vmul.f32 %v3230_v29, %v1034_v14  ;;  %v4201_v1 = vmul.f32 %v3230_v29, %v1035_v28 }
 0x294   :  { %v4203_v7 = vmul.f32 %v3230_v29, %v1036_v38  ;;  %v4205_v35 = vmul.f32 %v3230_v29, %v1037_v63  ;;  %v4207_v42 = vmul.f32 %v3230_v29, %v1038_v19  ;;  %v4209_v43 = vmul.f32 %v3230_v29, %v1039_v58 }
 0x295   :  { %v4211_v45 = vmul.f32 %v3230_v29, %v1040_v11  ;;  %v4213_v47 = vmul.f32 %v3230_v29, %v1041_v0  ;;  %v4215_v48 = vmul.f32 %v3230_v29, %v1042_v41  ;;  %v4217_v56 = vmul.f32 %v3230_v29, %v1044_v50 }
 0x296   :  { %v4219_v4 = vmul.f32 %v3230_v29, %v1045_v37  ;;  %v4222_v8 = vmul.f32 0.01, %v4156_v27  ;;  %v4225_v12 = vmul.f32 0.01, %v4158_v26  ;;  %v1082_v16 = vmul.f32 0.01, %v4160_v60 }
 0x297   :  { %v1083_v46 = vmul.f32 0.01, %v4162_v9  ;;  %v1084_v57 = vmul.f32 0.01, %v4164_v20  ;;  %v1085_v33 = vmul.f32 0.01, %v4166_v32 }
 0x298   :  { %v1086_v15 = vmul.f32 0.01, %v4168_v18  ;;  %v1087_v23 = vmul.f32 0.01, %v4170_v22  ;;  %v1112_v54 = vmax.f32 %v4156_v27, %v4222_v8  ;;  %v1088_v39 = vmul.f32 0.01, %v4172_v10 }
 0x299   :  { %v1089_v44 = vmul.f32 0.01, %v4174_v3  ;;  %v1090_v30 = vmul.f32 0.01, %v4176_v52  ;;  %v1113_v5 = vmax.f32 %v4158_v26, %v4225_v12  ;;  %v1091_v17 = vmul.f32 0.01, %v4178_v36 }
 0x29a   :  { %v1092_v55 = vmul.f32 0.01, %v4180_v59  ;;  %v1093_v31 = vmul.f32 0.01, %v4182_v25  ;;  %v1114_v24 = vmax.f32 %v4160_v60, %v1082_v16  ;;  %v1094_v2 = vmul.f32 0.01, %v4187_v51 }
 0x29b   :  { %v1095_v14 = vmul.f32 0.01, %v4189_v21  ;;  %v1096_v28 = vmul.f32 0.01, %v4191_v53  ;;  %v1115_v38 = vmax.f32 %v4162_v9, %v1083_v46  ;;  %v1097_v63 = vmul.f32 0.01, %v4193_v49 }
 0x29c   :  { %v1098_v19 = vmul.f32 0.01, %v4195_v62  ;;  %v1099_v58 = vmul.f32 0.01, %v4197_v40  ;;  %v1116_v11 = vmax.f32 %v4164_v20, %v1084_v57  ;;  %v1100_v0 = vmul.f32 0.01, %v4199_v34 }
 0x29d   :  { %v1101_v41 = vmul.f32 0.01, %v4201_v1  ;;  %v1102_v50 = vmul.f32 0.01, %v4203_v7  ;;  %v1117_v37 = vmax.f32 %v4166_v32, %v1085_v33  ;;  %v1103_v29 = vmul.f32 0.01, %v4205_v35 }
 0x29e   :  { %v1104_v27 = vmul.f32 0.01, %v4207_v42  ;;  %v1105_v26 = vmul.f32 0.01, %v4209_v43  ;;  %v1118_v60 = vmax.f32 %v4168_v18, %v1086_v15  ;;  %v1106_v9 = vmul.f32 0.01, %v4211_v45 }
 0x29f   :  { %v1107_v20 = vmul.f32 0.01, %v4213_v47  ;;  %v1108_v8 = vmul.f32 0.01, %v4215_v48  ;;  %v1119_v12 = vmax.f32 %v4170_v22, %v1087_v23  ;;  %v1110_v16 = vmul.f32 0.01, %v4217_v56 }
 0x2a0   :  { %v1111_v32 = vmul.f32 0.01, %v4219_v4  ;;  %v1120_v46 = vmax.f32 %v4172_v10, %v1088_v39  ;;  %v1121_v57 = vmax.f32 %v4174_v3, %v1089_v44  ;;  %v1122_v33 = vmax.f32 %v4176_v52, %v1090_v30 }
 0x2a1   :  { %v1123_v18 = vmax.f32 %v4178_v36, %v1091_v17  ;;  %v1124_v15 = vmax.f32 %v4180_v59, %v1092_v55  ;;  %v1125_v13 = vmax.f32 %v4182_v25, %v1093_v31  ;;  %v1126_v61 = vmax.f32 %v4187_v51, %v1094_v2  ;;  %v5388_v31 = vld [vmem:[#allocation2_spill] sm:$0xff] }
 0x2a2   :  { %v1127_v22 = vmax.f32 %v4189_v21, %v1095_v14  ;;  %v1128_v23 = vmax.f32 %v4191_v53, %v1096_v28  ;;  %v1129_v6 = vmax.f32 %v4193_v49, %v1097_v63  ;;  %v1130_v10 = vmax.f32 %v4195_v62, %v1098_v19 }
 0x2a3   :  { %v1131_v3 = vmax.f32 %v4197_v40, %v1099_v58  ;;  %v1132_v52 = vmax.f32 %v4199_v34, %v1100_v0  ;;  %v1133_v36 = vmax.f32 %v4201_v1, %v1101_v41  ;;  %v1134_v59 = vmax.f32 %v4203_v7, %v1102_v50 }
 0x2a4   :  { %v1135_v25 = vmax.f32 %v4205_v35, %v1103_v29  ;;  %v1136_v51 = vmax.f32 %v4207_v42, %v1104_v27  ;;  %v1137_v21 = vmax.f32 %v4209_v43, %v1105_v26  ;;  %v1138_v53 = vmax.f32 %v4211_v45, %v1106_v9 }
 0x2a5   :  { %v1139_v49 = vmax.f32 %v4213_v47, %v1107_v20  ;;  %v1140_v62 = vmax.f32 %v4215_v48, %v1108_v8  ;;  %v1142_v40 = vmax.f32 %v4217_v56, %v1110_v16  ;;  %v1143_v34 = vmax.f32 %v4219_v4, %v1111_v32  ;;  %v5389_v4 = vld [vmem:[#allocation3_spill] sm:$0xff] }
 0x2a6   :  { %v1145_v39 = vpack.c.bf16 %v1115_v38, %v1114_v24  ;;  %v1144_v1 = vpack.c.bf16 %v1113_v5, %v1112_v54  ;;  %v1146_v44 = vpack.c.bf16 %v1117_v37, %v1116_v11  ;;  %v1147_v7 = vpack.c.bf16 %v1119_v12, %v1118_v60 }
 0x2a7   :  { %v1148_v30 = vpack.c.bf16 %v1121_v57, %v1120_v46  ;;  %v1149_v35 = vpack.c.bf16 %v1123_v18, %v1122_v33  ;;  %v1150_v17 = vpack.c.bf16 %v1125_v13, %v1124_v15  ;;  %v1151_v42 = vpack.c.bf16 %v1127_v22, %v1126_v61 }
 0x2a8   :  { %3071 = vmatprep.mubr.msk.bf16.mxu0 %vm839_vm2, %v1144_v1  ;;  %v1152_v43 = vpack.c.bf16 %v1129_v6, %v1128_v23  ;;  %v1153_v45 = vpack.c.bf16 %v1131_v3, %v1130_v10  ;;  %v1154_v55 = vpack.c.bf16 %v1133_v36, %v1132_v52  ;;  %v1155_v47 = vpack.c.bf16 %v1135_v25, %v1134_v59 }
 0x2a9   :  { %3072 = vmatmul.mubr.msk.bf16.vlgmr.msra.gmra.mrb[32].mxu0 %vm839_vm2, %v1145_v39  ;;  %v1156_v48 = vpack.c.bf16 %v1137_v21, %v1136_v51  ;;  %v1157_v56 = vpack.c.bf16 %v1139_v49, %v1138_v53  ;;  %v5390_v24 = vmax.f32 %v5388_v31, %v5389_v4  ;;  %v1159_v5 = vpack.c.bf16 %v1143_v34, %v1142_v40 }
 0x2aa   :  { %3075 = vmatprep.mubr.msk.bf16.mxu0 %vm839_vm2, %v1146_v44 }
 0x2ab   :  { %v1158_v54 = vpack.c.bf16 %v5390_v24, %v1140_v62 }
 0x2b1   :  { %3076 = vmatmul.mubr.msk.bf16.gmra.mrb[36].mxu0 %vm839_vm2, %v1147_v7  ;;  %v3221_v7 = vld [vmem:[%s5373_s5] sm:$0xff]  }
 0x2b2   :  { %3079 = vmatprep.mubr.msk.bf16.mxu0 %vm839_vm2, %v1148_v30  ;;  %3137 = vmatprep.subr.bf16.mxu0 %v3221_v7  ;;  %v3222_v30 = vld [vmem:[%s5373_s5 + $0x8] sm:$0xff]  }
 0x2b3   :  { %3138 = vmatpush3.bf16.msra.mxu0 %v3221_v7 }
 0x2b4   :  { %3139 = vmatprep.subr.bf16.mxu0 %v3222_v30 }
 0x2b7   :  { %3140 = vmatpush3.bf16.msra.mxu0 %v3222_v30 }
 0x2b9   :  { %3080 = vmatmul.mubr.msk.bf16.gmra.mrb[40].mxu0 %vm839_vm2, %v1149_v35  ;;  %v3223_v35 = vld [vmem:[%s5373_s5 + $0x10] sm:$0xff]  }
 0x2ba   :  { %3083 = vmatprep.mubr.msk.bf16.mxu0 %vm839_vm2, %v1150_v17  ;;  %3141 = vmatprep.subr.bf16.mxu0 %v3223_v35  ;;  %v3224_v17 = vld [vmem:[%s5373_s5 + $0x18] sm:$0xff]  }
 0x2bb   :  { %3142 = vmatpush3.bf16.msra.mxu0 %v3223_v35 }
 0x2bc   :  { %3143 = vmatprep.subr.bf16.mxu0 %v3224_v17 }
 0x2bf   :  { %3144 = vmatpush3.bf16.msra.mxu0 %v3224_v17 }
 0x2c1   :  { %3084 = vmatmul.mubr.msk.bf16.gmra.mrb[44].mxu0 %vm839_vm2, %v1151_v42 }
 0x2c2   :  { %3087 = vmatprep.mubr.msk.bf16.mxu0 %vm839_vm2, %v1152_v43 }
 0x2c9   :  { %3088 = vmatmul.mubr.msk.bf16.gmra.mrb[48].mxu0 %vm839_vm2, %v1153_v45 }
 0x2ca   :  { %3091 = vmatprep.mubr.msk.bf16.mxu0 %vm839_vm2, %v1154_v55 }
 0x2d1   :  { %3092 = vmatmul.mubr.msk.bf16.gmra.mrb[52].mxu0 %vm839_vm2, %v1155_v47 }
 0x2d2   :  { %3095 = vmatprep.mubr.msk.bf16.mxu0 %vm839_vm2, %v1156_v48 }
 0x2d9   :  { %3096 = vmatmul.mubr.msk.bf16.gmra.mrb[56].mxu0 %vm839_vm2, %v1157_v56 }
 0x2da   :  { %3099 = vmatprep.mubr.msk.bf16.mxu0 %vm839_vm2, %v1158_v54 }
 0x2e1   :  { %3100 = vmatmul.mubr.msk.bf16.gmra.mrb[60].mxu0 %vm839_vm2, %v1159_v5 }
 0x37c   :  { %v3073_v6 = vpop.f32.mrb[32].mxu0 }
 0x37d   :  { %v1274_v61 = vpop.f32.mrb[33].mxu0 }
 0x37e   :  { %v3074_v13 = vpop.f32.mrb[34].mxu0 }
 0x37f   :  { %v1402_v2 = vpack.c.bf16 %v3074_v13, %v3073_v6  ;;  %v1277_v14 = vpop.f32.mrb[35].mxu0 }
 0x380   :  { %v1401_v28 = vpack.c.bf16 %v1277_v14, %v1274_v61 }
 0x382   :  { %3105 = vmatprep.mubr.msk.bf16.mxu1 %vm1418_vm4, %v1401_v28 }
 0x383   :  { %3106 = vmatmul.mubr.msk.bf16.vlgmr.msra.gmra.mrb[32].mxu1 %vm1418_vm4, %v1402_v2 }
 0x384   :  { %v3077_v38 = vpop.f32.mrb[36].mxu0 }
 0x385   :  { %v1290_v63 = vpop.f32.mrb[37].mxu0 }
 0x386   :  { %v3078_v19 = vpop.f32.mrb[38].mxu0 }
 0x387   :  { %v1404_v58 = vpack.c.bf16 %v3078_v19, %v3077_v38  ;;  %v1293_v11 = vpop.f32.mrb[39].mxu0 }
 0x388   :  { %v1403_v0 = vpack.c.bf16 %v1293_v11, %v1290_v63 }
 0x38a   :  { %3109 = vmatprep.mubr.msk.bf16.mxu1 %vm1418_vm4, %v1403_v0 }
 0x38b   :  { %3110 = vmatmul.mubr.msk.bf16.gmra.mrb[36].mxu1 %vm1418_vm4, %v1404_v58 }
 0x38c   :  { %v3081_v41 = vpop.f32.mrb[40].mxu0 }
 0x38d   :  { %v1306_v50 = vpop.f32.mrb[41].mxu0 }
 0x38e   :  { %v3082_v37 = vpop.f32.mrb[42].mxu0 }
 0x38f   :  { %v1406_v29 = vpack.c.bf16 %v3082_v37, %v3081_v41  ;;  %v1309_v27 = vpop.f32.mrb[43].mxu0 }
 0x390   :  { %v1405_v26 = vpack.c.bf16 %v1309_v27, %v1306_v50 }
 0x392   :  { %3113 = vmatprep.mubr.msk.bf16.mxu1 %vm1418_vm4, %v1405_v26 }
 0x393   :  { %3114 = vmatmul.mubr.msk.bf16.gmra.mrb[40].mxu1 %vm1418_vm4, %v1406_v29 }
 0x394   :  { %v3085_v60 = vpop.f32.mrb[44].mxu0 }
 0x395   :  { %v1322_v9 = vpop.f32.mrb[45].mxu0 }
 0x396   :  { %v3086_v20 = vpop.f32.mrb[46].mxu0 }
 0x397   :  { %v1408_v8 = vpack.c.bf16 %v3086_v20, %v3085_v60  ;;  %v1325_v12 = vpop.f32.mrb[47].mxu0 }
 0x398   :  { %v1407_v16 = vpack.c.bf16 %v1325_v12, %v1322_v9 }
 0x39a   :  { %3117 = vmatprep.mubr.msk.bf16.mxu1 %vm1418_vm4, %v1407_v16 }
 0x39b   :  { %3118 = vmatmul.mubr.msk.bf16.gmra.mrb[44].mxu1 %vm1418_vm4, %v1408_v8 }
 0x39c   :  { %v3089_v32 = vpop.f32.mrb[48].mxu0 }
 0x39d   :  { %v1338_v46 = vpop.f32.mrb[49].mxu0 }
 0x39e   :  { %v3090_v57 = vpop.f32.mrb[50].mxu0 }
 0x39f   :  { %v1410_v33 = vpack.c.bf16 %v3090_v57, %v3089_v32  ;;  %v1341_v18 = vpop.f32.mrb[51].mxu0 }
 0x3a0   :  { %v1409_v15 = vpack.c.bf16 %v1341_v18, %v1338_v46 }
 0x3a2   :  { %3121 = vmatprep.mubr.msk.bf16.mxu1 %vm1418_vm4, %v1409_v15 }
 0x3a3   :  { %3122 = vmatmul.mubr.msk.bf16.gmra.mrb[48].mxu1 %vm1418_vm4, %v1410_v33 }
 0x3a4   :  { %v3093_v22 = vpop.f32.mrb[52].mxu0 }
 0x3a5   :  { %v1354_v23 = vpop.f32.mrb[53].mxu0 }
 0x3a6   :  { %v3094_v10 = vpop.f32.mrb[54].mxu0 }
 0x3a7   :  { %v1412_v3 = vpack.c.bf16 %v3094_v10, %v3093_v22  ;;  %v1357_v52 = vpop.f32.mrb[55].mxu0 }
 0x3a8   :  { %v1411_v36 = vpack.c.bf16 %v1357_v52, %v1354_v23 }
 0x3aa   :  { %3125 = vmatprep.mubr.msk.bf16.mxu1 %vm1418_vm4, %v1411_v36 }
 0x3ab   :  { %3126 = vmatmul.mubr.msk.bf16.gmra.mrb[52].mxu1 %vm1418_vm4, %v1412_v3 }
 0x3ac   :  { %v3097_v59 = vpop.f32.mrb[56].mxu0 }
 0x3ad   :  { %v1370_v25 = vpop.f32.mrb[57].mxu0 }
 0x3ae   :  { %v3098_v51 = vpop.f32.mrb[58].mxu0 }
 0x3af   :  { %v1414_v21 = vpack.c.bf16 %v3098_v51, %v3097_v59  ;;  %v1373_v53 = vpop.f32.mrb[59].mxu0 }
 0x3b0   :  { %v1413_v49 = vpack.c.bf16 %v1373_v53, %v1370_v25 }
 0x3b2   :  { %3129 = vmatprep.mubr.msk.bf16.mxu1 %vm1418_vm4, %v1413_v49 }
 0x3b3   :  { %3130 = vmatmul.mubr.msk.bf16.gmra.mrb[56].mxu1 %vm1418_vm4, %v1414_v21 }
 0x3b4   :  { %v3101_v62 = vpop.f32.mrb[60].mxu0 }
 0x3b5   :  { %v1386_v40 = vpop.f32.mrb[61].mxu0 }
 0x3b6   :  { %v3102_v34 = vpop.f32.mrb[62].mxu0 }
 0x3b7   :  { %v1416_v39 = vpack.c.bf16 %v3102_v34, %v3101_v62  ;;  %v1389_v1 = vpop.f32.mrb[63].mxu0 }
 0x3b8   :  { %v1415_v44 = vpack.c.bf16 %v1389_v1, %v1386_v40 }
 0x3ba   :  { %3133 = vmatprep.mubr.msk.bf16.mxu1 %vm1418_vm4, %v1415_v44 }
 0x3bb   :  { %3134 = vmatmul.mubr.msk.bf16.gmra.mrb[60].mxu1 %vm1418_vm4, %v1416_v39 }
 0x456   :  { %v4338_v42 = vpop.f32.mrb[32].mxu1 }
 0x457   :  { %v4340_v43 = vpop.f32.mrb[33].mxu1  ;;  %v1703_v48 = vmul.f32 %v4338_v42, %v4338_v42  ;;  %v1635_v54 = vsel %vm839_vm2, %v4338_v42, 0.0 }
 0x458   :  { %v1701_v45 = vmul.f32 %v4340_v43, %v4340_v43  ;;  %v4344_v55 = vpop.f32.mrb[34].mxu1  ;;  %v1632_v56 = vsel %vm839_vm2, %v4340_v43, 0.0 }
 0x459   :  { %v4346_v47 = vpop.f32.mrb[35].mxu1  ;;  %v1704_v6 = vmul.f32 %v4344_v55, %v4344_v55  ;;  %v1736_v14 = vsel %vm839_vm2, %v1703_v48, 0.0  ;;  %v1637_v28 = vsel %vm839_vm2, %v4344_v55, 0.0 }
 0x45a   :  { %v1633_v31 = vsel %vm839_vm2, %v4346_v47, 0.0  ;;  %v1702_v4 = vmul.f32 %v4346_v47, %v4346_v47  ;;  %v1733_v5 = vsel %vm839_vm2, %v1701_v45, 0.0 }
 0x45b   :  { %v1634_v24 = vadd.f32 %v1633_v31, %v1632_v56  ;;  %v1738_v11 = vsel %vm839_vm2, %v1704_v6, 0.0 }
 0x45c   :  { %v1734_v61 = vsel %vm839_vm2, %v1702_v4, 0.0 }
 0x45d   :  { %v1636_v13 = vadd.f32 %v1635_v54, %v1634_v24  ;;  %v1735_v2 = vadd.f32 %v1734_v61, %v1733_v5 }
 0x45e   :  { %v4365_v38 = vpop.f32.mrb[36].mxu1 }
 0x45f   :  { %v1737_v63 = vadd.f32 %v1736_v14, %v1735_v2  ;;  %v4367_v19 = vpop.f32.mrb[37].mxu1  ;;  %v1638_v58 = vadd.f32 %v1637_v28, %v1636_v13  ;;  %v1707_v26 = vmul.f32 %v4365_v38, %v4365_v38  ;;  %v1643_v16 = vsel %vm839_vm2, %v4365_v38, 0.0 }
 0x460   :  { %v1639_v0 = vsel %vm839_vm2, %v4367_v19, 0.0  ;;  %v1705_v41 = vmul.f32 %v4367_v19, %v4367_v19  ;;  %v4374_v50 = vpop.f32.mrb[38].mxu1 }
 0x461   :  { %v1640_v37 = vadd.f32 %v1639_v0, %v1638_v58  ;;  %v1739_v29 = vadd.f32 %v1738_v11, %v1737_v63  ;;  %v4376_v27 = vpop.f32.mrb[39].mxu1  ;;  %v1708_v32 = vmul.f32 %v4374_v50, %v4374_v50  ;;  %v1744_v18 = vsel %vm839_vm2, %v1707_v26, 0.0 }
 0x462   :  { %v1740_v60 = vsel %vm839_vm2, %v1705_v41, 0.0  ;;  %v1641_v9 = vsel %vm839_vm2, %v4376_v27, 0.0  ;;  %v1706_v20 = vmul.f32 %v4376_v27, %v4376_v27  ;;  %v1645_v15 = vsel %vm839_vm2, %v4374_v50, 0.0 }
 0x463   :  { %v1741_v8 = vadd.f32 %v1740_v60, %v1739_v29  ;;  %v1642_v12 = vadd.f32 %v1641_v9, %v1640_v37  ;;  %v1746_v52 = vsel %vm839_vm2, %v1708_v32, 0.0 }
 0x464   :  { %v1742_v46 = vsel %vm839_vm2, %v1706_v20, 0.0 }
 0x465   :  { %v1644_v57 = vadd.f32 %v1643_v16, %v1642_v12  ;;  %v1743_v33 = vadd.f32 %v1742_v46, %v1741_v8 }
 0x466   :  { %v4393_v22 = vpop.f32.mrb[40].mxu1 }
 0x467   :  { %v1745_v23 = vadd.f32 %v1744_v18, %v1743_v33  ;;  %v4395_v10 = vpop.f32.mrb[41].mxu1  ;;  %v1646_v3 = vadd.f32 %v1645_v15, %v1644_v57  ;;  %v1711_v49 = vmul.f32 %v4393_v22, %v4393_v22  ;;  %v1651_v44 = vsel %vm839_vm2, %v4393_v22, 0.0 }
 0x468   :  { %v1647_v36 = vsel %vm839_vm2, %v4395_v10, 0.0  ;;  %v1709_v59 = vmul.f32 %v4395_v10, %v4395_v10  ;;  %v4402_v25 = vpop.f32.mrb[42].mxu1 }
 0x469   :  { %v1648_v51 = vadd.f32 %v1647_v36, %v1646_v3  ;;  %v1747_v21 = vadd.f32 %v1746_v52, %v1745_v23  ;;  %v4404_v53 = vpop.f32.mrb[43].mxu1  ;;  %v1712_v7 = vmul.f32 %v4402_v25, %v4402_v25  ;;  %v1752_v45 = vsel %vm839_vm2, %v1711_v49, 0.0 }
 0x46a   :  { %v1748_v62 = vsel %vm839_vm2, %v1709_v59, 0.0  ;;  %v1649_v40 = vsel %vm839_vm2, %v4404_v53, 0.0  ;;  %v1710_v34 = vmul.f32 %v4404_v53, %v4404_v53  ;;  %v1653_v48 = vsel %vm839_vm2, %v4402_v25, 0.0 }
 0x46b   :  { %v1749_v39 = vadd.f32 %v1748_v62, %v1747_v21  ;;  %v1650_v1 = vadd.f32 %v1649_v40, %v1648_v51  ;;  %v1754_v54 = vsel %vm839_vm2, %v1712_v7, 0.0 }
 0x46c   :  { %v1750_v30 = vsel %vm839_vm2, %v1710_v34, 0.0 }
 0x46d   :  { %v1652_v35 = vadd.f32 %v1651_v44, %v1650_v1  ;;  %v1751_v17 = vadd.f32 %v1750_v30, %v1749_v39 }
 0x46e   :  { %v4421_v56 = vpop.f32.mrb[44].mxu1 }
 0x46f   :  { %v1753_v31 = vadd.f32 %v1752_v45, %v1751_v17  ;;  %v4423_v4 = vpop.f32.mrb[45].mxu1  ;;  %v1654_v24 = vadd.f32 %v1653_v48, %v1652_v35  ;;  %v1715_v28 = vmul.f32 %v4421_v56, %v4421_v56  ;;  %v1659_v37 = vsel %vm839_vm2, %v4421_v56, 0.0 }
 0x470   :  { %v1655_v5 = vsel %vm839_vm2, %v4423_v4, 0.0  ;;  %v1713_v6 = vmul.f32 %v4423_v4, %v4423_v4  ;;  %v4430_v61 = vpop.f32.mrb[46].mxu1 }
 0x471   :  { %v1656_v13 = vadd.f32 %v1655_v5, %v1654_v24  ;;  %v1755_v2 = vadd.f32 %v1754_v54, %v1753_v31  ;;  %v4432_v14 = vpop.f32.mrb[47].mxu1  ;;  %v1716_v29 = vmul.f32 %v4430_v61, %v4430_v61  ;;  %v1760_v20 = vsel %vm839_vm2, %v1715_v28, 0.0 }
 0x472   :  { %v1756_v63 = vsel %vm839_vm2, %v1713_v6, 0.0  ;;  %v1657_v58 = vsel %vm839_vm2, %v4432_v14, 0.0  ;;  %v1714_v11 = vmul.f32 %v4432_v14, %v4432_v14  ;;  %v1661_v8 = vsel %vm839_vm2, %v4430_v61, 0.0 }
 0x473   :  { %v1757_v0 = vadd.f32 %v1756_v63, %v1755_v2  ;;  %v1658_v41 = vadd.f32 %v1657_v58, %v1656_v13  ;;  %v1762_v57 = vsel %vm839_vm2, %v1716_v29, 0.0 }
 0x474   :  { %v1758_v26 = vsel %vm839_vm2, %v1714_v11, 0.0 }
 0x475   :  { %v1660_v60 = vadd.f32 %v1659_v37, %v1658_v41  ;;  %v1759_v9 = vadd.f32 %v1758_v26, %v1757_v0 }
 0x476   :  { %v4449_v12 = vpop.f32.mrb[48].mxu1 }
 0x477   :  { %v1761_v16 = vadd.f32 %v1760_v20, %v1759_v9  ;;  %v4451_v32 = vpop.f32.mrb[49].mxu1  ;;  %v1662_v46 = vadd.f32 %v1661_v8, %v1660_v60  ;;  %v1719_v36 = vmul.f32 %v4449_v12, %v4449_v12  ;;  %v1667_v40 = vsel %vm839_vm2, %v4449_v12, 0.0 }
 0x478   :  { %v1663_v33 = vsel %vm839_vm2, %v4451_v32, 0.0  ;;  %v1717_v18 = vmul.f32 %v4451_v32, %v4451_v32  ;;  %v4458_v15 = vpop.f32.mrb[50].mxu1 }
 0x479   :  { %v1664_v23 = vadd.f32 %v1663_v33, %v1662_v46  ;;  %v1763_v3 = vadd.f32 %v1762_v57, %v1761_v16  ;;  %v4460_v52 = vpop.f32.mrb[51].mxu1  ;;  %v1720_v34 = vmul.f32 %v4458_v15, %v4458_v15  ;;  %v1768_v7 = vsel %vm839_vm2, %v1719_v36, 0.0 }
 0x47a   :  { %v1764_v59 = vsel %vm839_vm2, %v1717_v18, 0.0  ;;  %v1665_v51 = vsel %vm839_vm2, %v4460_v52, 0.0  ;;  %v1718_v21 = vmul.f32 %v4460_v52, %v4460_v52  ;;  %v1669_v30 = vsel %vm839_vm2, %v4458_v15, 0.0 }
 0x47b   :  { %v1765_v49 = vadd.f32 %v1764_v59, %v1763_v3  ;;  %v1666_v62 = vadd.f32 %v1665_v51, %v1664_v23  ;;  %v1770_v31 = vsel %vm839_vm2, %v1720_v34, 0.0 }
 0x47c   :  { %v1766_v39 = vsel %vm839_vm2, %v1718_v21, 0.0 }
 0x47d   :  { %v1668_v1 = vadd.f32 %v1667_v40, %v1666_v62  ;;  %v1767_v44 = vadd.f32 %v1766_v39, %v1765_v49 }
 0x47e   :  { %v4477_v35 = vpop.f32.mrb[52].mxu1 }
 0x47f   :  { %v1769_v17 = vadd.f32 %v1768_v7, %v1767_v44  ;;  %v4479_v45 = vpop.f32.mrb[53].mxu1  ;;  %v1670_v48 = vadd.f32 %v1669_v30, %v1668_v1  ;;  %v1723_v28 = vmul.f32 %v4477_v35, %v4477_v35  ;;  %v1675_v37 = vsel %vm839_vm2, %v4477_v35, 0.0 }
 0x480   :  { %v1671_v24 = vsel %vm839_vm2, %v4479_v45, 0.0  ;;  %v1721_v54 = vmul.f32 %v4479_v45, %v4479_v45  ;;  %v4486_v5 = vpop.f32.mrb[54].mxu1 }
 0x481   :  { %v1672_v6 = vadd.f32 %v1671_v24, %v1670_v48  ;;  %v1771_v13 = vadd.f32 %v1770_v31, %v1769_v17  ;;  %v4488_v2 = vpop.f32.mrb[55].mxu1  ;;  %v1724_v29 = vmul.f32 %v4486_v5, %v4486_v5  ;;  %v1776_v20 = vsel %vm839_vm2, %v1723_v28, 0.0 }
 0x482   :  { %v1772_v63 = vsel %vm839_vm2, %v1721_v54, 0.0  ;;  %v1673_v58 = vsel %vm839_vm2, %v4488_v2, 0.0  ;;  %v1722_v11 = vmul.f32 %v4488_v2, %v4488_v2  ;;  %v1677_v8 = vsel %vm839_vm2, %v4486_v5, 0.0 }
 0x483   :  { %v1773_v0 = vadd.f32 %v1772_v63, %v1771_v13  ;;  %v1674_v41 = vadd.f32 %v1673_v58, %v1672_v6  ;;  %v1778_v18 = vsel %vm839_vm2, %v1724_v29, 0.0 }
 0x484   :  { %v1774_v26 = vsel %vm839_vm2, %v1722_v11, 0.0 }
 0x485   :  { %v1676_v60 = vadd.f32 %v1675_v37, %v1674_v41  ;;  %v1775_v9 = vadd.f32 %v1774_v26, %v1773_v0 }
 0x486   :  { %v4505_v16 = vpop.f32.mrb[56].mxu1 }
 0x487   :  { %v1777_v46 = vadd.f32 %v1776_v20, %v1775_v9  ;;  %v4507_v57 = vpop.f32.mrb[57].mxu1  ;;  %v1678_v33 = vadd.f32 %v1677_v8, %v1676_v60  ;;  %v1727_v49 = vmul.f32 %v4505_v16, %v4505_v16  ;;  %v1683_v44 = vsel %vm839_vm2, %v4505_v16, 0.0 }
 0x488   :  { %v1679_v23 = vsel %vm839_vm2, %v4507_v57, 0.0  ;;  %v1725_v3 = vmul.f32 %v4507_v57, %v4507_v57  ;;  %v4514_v36 = vpop.f32.mrb[58].mxu1 }
 0x489   :  { %v1680_v59 = vadd.f32 %v1679_v23, %v1678_v33  ;;  %v1779_v51 = vadd.f32 %v1778_v18, %v1777_v46  ;;  %v4516_v21 = vpop.f32.mrb[59].mxu1  ;;  %v1728_v7 = vmul.f32 %v4514_v36, %v4514_v36  ;;  %v1784_v31 = vsel %vm839_vm2, %v1727_v49, 0.0 }
 0x48a   :  { %v1780_v62 = vsel %vm839_vm2, %v1725_v3, 0.0  ;;  %v1681_v40 = vsel %vm839_vm2, %v4516_v21, 0.0  ;;  %v1726_v34 = vmul.f32 %v4516_v21, %v4516_v21  ;;  %v1685_v24 = vsel %vm839_vm2, %v4514_v36, 0.0 }
 0x48b   :  { %v1781_v39 = vadd.f32 %v1780_v62, %v1779_v51  ;;  %v1682_v1 = vadd.f32 %v1681_v40, %v1680_v59  ;;  %v1786_v63 = vsel %vm839_vm2, %v1728_v7, 0.0 }
 0x48c   :  { %v1782_v30 = vsel %vm839_vm2, %v1726_v34, 0.0 }
 0x48d   :  { %v1684_v17 = vadd.f32 %v1683_v44, %v1682_v1  ;;  %v1783_v48 = vadd.f32 %v1782_v30, %v1781_v39 }
 0x48e   :  { %v4533_v54 = vpop.f32.mrb[60].mxu1 }
 0x48f   :  { %v1785_v6 = vadd.f32 %v1784_v31, %v1783_v48  ;;  %v4535_v13 = vpop.f32.mrb[61].mxu1  ;;  %v1686_v28 = vadd.f32 %v1685_v24, %v1684_v17  ;;  %v1731_v26 = vmul.f32 %v4533_v54, %v4533_v54  ;;  %v1691_v33 = vsel %vm839_vm2, %v4533_v54, 0.0 }
 0x490   :  { %v1687_v58 = vsel %vm839_vm2, %v4535_v13, 0.0  ;;  %v1729_v11 = vmul.f32 %v4535_v13, %v4535_v13  ;;  %v4542_v0 = vpop.f32.mrb[62].mxu1 }
 0x491   :  { %v1688_v41 = vadd.f32 %v1687_v58, %v1686_v28  ;;  %v1787_v37 = vadd.f32 %v1786_v63, %v1785_v6  ;;  %v4544_v29 = vpop.f32.mrb[63].mxu1  ;;  %v1732_v18 = vmul.f32 %v4542_v0, %v4542_v0  ;;  %v1792_v51 = vsel %vm839_vm2, %v1731_v26, 0.0 }
 0x492   :  { %v1788_v60 = vsel %vm839_vm2, %v1729_v11, 0.0  ;;  %v1689_v9 = vsel %vm839_vm2, %v4544_v29, 0.0  ;;  %v1730_v20 = vmul.f32 %v4544_v29, %v4544_v29  ;;  %v1693_v49 = vsel %vm839_vm2, %v4542_v0, 0.0 }
 0x493   :  { %v1789_v8 = vadd.f32 %v1788_v60, %v1787_v37  ;;  %v1690_v46 = vadd.f32 %v1689_v9, %v1688_v41  ;;  %v1794_v34 = vsel %vm839_vm2, %v1732_v18, 0.0 }
 0x494   :  { %v1790_v23 = vsel %vm839_vm2, %v1730_v20, 0.0 }
 0x495   :  { %v1692_v3 = vadd.f32 %v1691_v33, %v1690_v46  ;;  %v1791_v59 = vadd.f32 %v1790_v23, %v1789_v8 }
 0x497   :  { %v1694_v62 = vadd.f32 %v1693_v49, %v1692_v3  ;;  %v1793_v40 = vadd.f32 %v1792_v51, %v1791_v59 }
 0x499   :  { %v1695_v39 = vrot.slane %v1694_v62, 4  ;;  %v1795_v1 = vadd.f32 %v1794_v34, %v1793_v40 }
 0x49b   :  { %v1696_v44 = vadd.f32 %v1695_v39, %v1694_v62  ;;  %v1796_v7 = vrot.slane %v1795_v1, 4 }
 0x49d   :  { %v1697_v30 = vrot.slane %v1696_v44, 2  ;;  %v1797_v17 = vadd.f32 %v1796_v7, %v1795_v1 }
 0x49f   :  { %v1698_v48 = vadd.f32 %v1697_v30, %v1696_v44  ;;  %v1798_v31 = vrot.slane %v1797_v17, 2 }
 0x4a1   :  { %v1699_v24 = vrot.slane %v1698_v48, 1  ;;  %v1799_v6 = vadd.f32 %v1798_v31, %v1797_v17 }
 0x4a3   :  { %v1700_v28 = vadd.f32 %v1699_v24, %v1698_v48  ;;  %v1800_v63 = vrot.slane %v1799_v6, 1 }
 0x4a5   :  { %v1801_v58 = vadd.f32 %v1800_v63, %v1799_v6  ;;  %v4562_v11 = vmul.f32 0.00390625, %v1700_v28 }
 0x4a7   :  { %v1803_v41 = vmul.f32 0.00390625, %v1801_v58  ;;  %v1804_v37 = vmul.f32 %v4562_v11, %v4562_v11  ;;  %v1835_v26 = vsub.f32 %v4544_v29, %v4562_v11  ;;  %v1806_v60 = vsub.f32 %v4340_v43, %v4562_v11 }
 0x4a8   :  { %v1807_v9 = vsub.f32 %v4346_v47, %v4562_v11  ;;  %v1808_v20 = vsub.f32 %v4338_v42, %v4562_v11  ;;  %v1809_v8 = vsub.f32 %v4344_v55, %v4562_v11  ;;  %v1810_v46 = vsub.f32 %v4367_v19, %v4562_v11 }
 0x4a9   :  { %v1805_v33 = vsub.f32 %v1803_v41, %v1804_v37  ;;  %v1811_v18 = vsub.f32 %v4376_v27, %v4562_v11  ;;  %v1812_v29 = vsub.f32 %v4365_v38, %v4562_v11  ;;  %v1813_v43 = vsub.f32 %v4374_v50, %v4562_v11 }
 0x4aa   :  { %v1814_v47 = vsub.f32 %v4395_v10, %v4562_v11  ;;  %v1815_v42 = vsub.f32 %v4404_v53, %v4562_v11  ;;  %v1816_v55 = vsub.f32 %v4393_v22, %v4562_v11  ;;  %v1817_v19 = vsub.f32 %v4402_v25, %v4562_v11 }
 0x4ab   :  { %v1838_v23 = vadd.f32 1e-05, %v1805_v33  ;;  %v1818_v27 = vsub.f32 %v4423_v4, %v4562_v11  ;;  %v1819_v38 = vsub.f32 %v4432_v14, %v4562_v11  ;;  %v1820_v50 = vsub.f32 %v4421_v56, %v4562_v11 }
 0x4ac   :  { %v1821_v10 = vsub.f32 %v4430_v61, %v4562_v11  ;;  %v1822_v53 = vsub.f32 %v4451_v32, %v4562_v11  ;;  %v1823_v22 = vsub.f32 %v4460_v52, %v4562_v11  ;;  %v1824_v25 = vsub.f32 %v4449_v12, %v4562_v11 }
 0x4ad   :  { %3231 = vrsqrt.f32 %v1838_v23  ;;  %v1825_v4 = vsub.f32 %v4458_v15, %v4562_v11  ;;  %v1826_v14 = vsub.f32 %v4479_v45, %v4562_v11  ;;  %v1827_v56 = vsub.f32 %v4488_v2, %v4562_v11 }
 0x4ae   :  { %v1828_v61 = vsub.f32 %v4477_v35, %v4562_v11  ;;  %v1829_v32 = vsub.f32 %v4486_v5, %v4562_v11  ;;  %v1830_v52 = vsub.f32 %v4507_v57, %v4562_v11  ;;  %v1831_v12 = vsub.f32 %v4516_v21, %v4562_v11 }
 0x4af   :  { %v1832_v15 = vsub.f32 %v4505_v16, %v4562_v11  ;;  %v1833_v45 = vsub.f32 %v4514_v36, %v4562_v11  ;;  %v1834_v2 = vsub.f32 %v4535_v13, %v4562_v11  ;;  %v1836_v35 = vsub.f32 %v4533_v54, %v4562_v11 }
 0x4b0   :  { %v1837_v5 = vsub.f32 %v4542_v0, %v4562_v11 }
 0x4b7   :  { %v3232_v3 = vpop.eup %3231 }
 0x4b8   :  { %v4630_v57 = vmul.f32 %v3232_v3, %v1835_v26  ;;  %v4632_v59 = vmul.f32 %v3232_v3, %v1806_v60  ;;  %v4634_v21 = vmul.f32 %v3232_v3, %v1807_v9  ;;  %v4636_v16 = vmul.f32 %v3232_v3, %v1808_v20 }
 0x4b9   :  { %v4638_v51 = vmul.f32 %v3232_v3, %v1809_v8  ;;  %v4640_v36 = vmul.f32 %v3232_v3, %v1810_v46  ;;  %v4642_v13 = vmul.f32 %v3232_v3, %v1811_v18  ;;  %v4644_v49 = vmul.f32 %v3232_v3, %v1812_v29 }
 0x4ba   :  { %5391 = vst [vmem:[#allocation2_spill] sm:$0xff] %v4630_v57  ;;  %v4646_v54 = vmul.f32 %v3232_v3, %v1813_v43  ;;  %v4648_v0 = vmul.f32 %v3232_v3, %v1814_v47  ;;  %v4650_v62 = vmul.f32 %v3232_v3, %v1815_v42  ;;  %v4652_v40 = vmul.f32 %v3232_v3, %v1816_v55 }
 0x4bb   :  { %v4654_v34 = vmul.f32 %v3232_v3, %v1817_v19  ;;  %v4656_v39 = vmul.f32 %v3232_v3, %v1818_v27  ;;  %v4658_v1 = vmul.f32 %v3232_v3, %v1819_v38  ;;  %v4661_v44 = vmul.f32 0.01, %v4630_v57 }
 0x4bc   :  { %v4663_v7 = vmul.f32 %v3232_v3, %v1820_v50  ;;  %v4665_v30 = vmul.f32 %v3232_v3, %v1821_v10  ;;  %v4667_v17 = vmul.f32 %v3232_v3, %v1822_v53  ;;  %v4669_v48 = vmul.f32 %v3232_v3, %v1823_v22 }
 0x4bd   :  { %5392 = vst [vmem:[#allocation3_spill] sm:$0xff] %v4661_v44  ;;  %v4671_v31 = vmul.f32 %v3232_v3, %v1824_v25  ;;  %v4673_v24 = vmul.f32 %v3232_v3, %v1825_v4  ;;  %v4675_v6 = vmul.f32 %v3232_v3, %v1826_v14  ;;  %v4677_v28 = vmul.f32 %v3232_v3, %v1827_v56 }
 0x4be   :  { %v4679_v63 = vmul.f32 %v3232_v3, %v1828_v61  ;;  %v4681_v58 = vmul.f32 %v3232_v3, %v1829_v32  ;;  %v4683_v11 = vmul.f32 %v3232_v3, %v1830_v52  ;;  %v4685_v41 = vmul.f32 %v3232_v3, %v1831_v12 }
 0x4bf   :  { %v4687_v37 = vmul.f32 %v3232_v3, %v1832_v15  ;;  %v4689_v26 = vmul.f32 %v3232_v3, %v1833_v45  ;;  %v4691_v60 = vmul.f32 %v3232_v3, %v1834_v2  ;;  %v4693_v9 = vmul.f32 %v3232_v3, %v1836_v35 }
 0x4c0   :  { %v4695_v20 = vmul.f32 %v3232_v3, %v1837_v5  ;;  %v4698_v8 = vmul.f32 0.01, %v4632_v59  ;;  %v4701_v46 = vmul.f32 0.01, %v4634_v21  ;;  %v1874_v18 = vmul.f32 0.01, %v4636_v16 }
 0x4c1   :  { %v1875_v29 = vmul.f32 0.01, %v4638_v51  ;;  %v1876_v43 = vmul.f32 0.01, %v4640_v36  ;;  %v1877_v47 = vmul.f32 0.01, %v4642_v13 }
 0x4c2   :  { %v1878_v42 = vmul.f32 0.01, %v4644_v49  ;;  %v1879_v55 = vmul.f32 0.01, %v4646_v54  ;;  %v1904_v19 = vmax.f32 %v4632_v59, %v4698_v8  ;;  %v1880_v23 = vmul.f32 0.01, %v4648_v0 }
 0x4c3   :  { %v1881_v27 = vmul.f32 0.01, %v4650_v62  ;;  %v1882_v38 = vmul.f32 0.01, %v4652_v40  ;;  %v1905_v50 = vmax.f32 %v4634_v21, %v4701_v46  ;;  %v1883_v10 = vmul.f32 0.01, %v4654_v34 }
 0x4c4   :  { %v1884_v53 = vmul.f32 0.01, %v4656_v39  ;;  %v1885_v22 = vmul.f32 0.01, %v4658_v1  ;;  %v1906_v25 = vmax.f32 %v4636_v16, %v1874_v18  ;;  %v1886_v4 = vmul.f32 0.01, %v4663_v7 }
 0x4c5   :  { %v1887_v14 = vmul.f32 0.01, %v4665_v30  ;;  %v1888_v56 = vmul.f32 0.01, %v4667_v17  ;;  %v1907_v61 = vmax.f32 %v4638_v51, %v1875_v29  ;;  %v1889_v32 = vmul.f32 0.01, %v4669_v48 }
 0x4c6   :  { %v1890_v52 = vmul.f32 0.01, %v4671_v31  ;;  %v1891_v12 = vmul.f32 0.01, %v4673_v24  ;;  %v1908_v15 = vmax.f32 %v4640_v36, %v1876_v43  ;;  %v1892_v45 = vmul.f32 0.01, %v4675_v6 }
 0x4c7   :  { %v1893_v2 = vmul.f32 0.01, %v4677_v28  ;;  %v1894_v35 = vmul.f32 0.01, %v4679_v63  ;;  %v1909_v5 = vmax.f32 %v4642_v13, %v1877_v47  ;;  %v1895_v3 = vmul.f32 0.01, %v4681_v58 }
 0x4c8   :  { %v1896_v59 = vmul.f32 0.01, %v4683_v11  ;;  %v1897_v21 = vmul.f32 0.01, %v4685_v41  ;;  %v1910_v16 = vmax.f32 %v4644_v49, %v1878_v42  ;;  %v1898_v51 = vmul.f32 0.01, %v4687_v37 }
 0x4c9   :  { %v1899_v36 = vmul.f32 0.01, %v4689_v26  ;;  %v1900_v8 = vmul.f32 0.01, %v4691_v60  ;;  %v1911_v46 = vmax.f32 %v4646_v54, %v1879_v55  ;;  %v1902_v18 = vmul.f32 0.01, %v4693_v9 }
 0x4ca   :  { %v1903_v13 = vmul.f32 0.01, %v4695_v20  ;;  %v1912_v29 = vmax.f32 %v4648_v0, %v1880_v23  ;;  %v1913_v43 = vmax.f32 %v4650_v62, %v1881_v27  ;;  %v1914_v47 = vmax.f32 %v4652_v40, %v1882_v38 }
 0x4cb   :  { %v1915_v49 = vmax.f32 %v4654_v34, %v1883_v10  ;;  %v1916_v42 = vmax.f32 %v4656_v39, %v1884_v53  ;;  %v1917_v33 = vmax.f32 %v4658_v1, %v1885_v22  ;;  %v1918_v44 = vmax.f32 %v4663_v7, %v1886_v4  ;;  %v5393_v22 = vld [vmem:[#allocation2_spill] sm:$0xff] }
 0x4cc   :  { %v1919_v54 = vmax.f32 %v4665_v30, %v1887_v14  ;;  %v1920_v55 = vmax.f32 %v4667_v17, %v1888_v56  ;;  %v1921_v57 = vmax.f32 %v4669_v48, %v1889_v32  ;;  %v1922_v0 = vmax.f32 %v4671_v31, %v1890_v52 }
 0x4cd   :  { %v1923_v62 = vmax.f32 %v4673_v24, %v1891_v12  ;;  %v1924_v40 = vmax.f32 %v4675_v6, %v1892_v45  ;;  %v1925_v34 = vmax.f32 %v4677_v28, %v1893_v2  ;;  %v1926_v39 = vmax.f32 %v4679_v63, %v1894_v35 }
 0x4ce   :  { %v1927_v1 = vmax.f32 %v4681_v58, %v1895_v3  ;;  %v1928_v7 = vmax.f32 %v4683_v11, %v1896_v59  ;;  %v1929_v30 = vmax.f32 %v4685_v41, %v1897_v21  ;;  %v1930_v17 = vmax.f32 %v4687_v37, %v1898_v51 }
 0x4cf   :  { %v1931_v48 = vmax.f32 %v4689_v26, %v1899_v36  ;;  %v1932_v31 = vmax.f32 %v4691_v60, %v1900_v8  ;;  %v1934_v24 = vmax.f32 %v4693_v9, %v1902_v18  ;;  %v1935_v6 = vmax.f32 %v4695_v20, %v1903_v13  ;;  %v5394_v20 = vld [vmem:[#allocation3_spill] sm:$0xff] }
 0x4d0   :  { %v1937_v23 = vpack.c.bf16 %v1907_v61, %v1906_v25  ;;  %v1936_v28 = vpack.c.bf16 %v1905_v50, %v1904_v19  ;;  %v1938_v27 = vpack.c.bf16 %v1909_v5, %v1908_v15  ;;  %v1939_v63 = vpack.c.bf16 %v1911_v46, %v1910_v16 }
 0x4d1   :  { %v1940_v38 = vpack.c.bf16 %v1913_v43, %v1912_v29  ;;  %v1941_v58 = vpack.c.bf16 %v1915_v49, %v1914_v47  ;;  %v1942_v10 = vpack.c.bf16 %v1917_v33, %v1916_v42  ;;  %v1943_v11 = vpack.c.bf16 %v1919_v54, %v1918_v44  ;;  %v3226_v44 = vld [vmem:[%s5374_s6 + $0x8] sm:$0xff]  }
 0x4d2   :  { %3145 = vmatprep.mubr.msk.bf16.mxu0 %vm839_vm2, %v1936_v28  ;;  %v1944_v41 = vpack.c.bf16 %v1921_v57, %v1920_v55  ;;  %v1945_v37 = vpack.c.bf16 %v1923_v62, %v1922_v0  ;;  %v1946_v53 = vpack.c.bf16 %v1925_v34, %v1924_v40  ;;  %v1947_v26 = vpack.c.bf16 %v1927_v1, %v1926_v39  ;;  %v3225_v57 = vld [vmem:[%s5374_s6] sm:$0xff]  }
 0x4d3   :  { %3146 = vmatmul.mubr.msk.bf16.vlgmr.msra.gmra.mrb[64].mxu0 %vm839_vm2, %v1937_v23  ;;  %v1948_v60 = vpack.c.bf16 %v1929_v30, %v1928_v7  ;;  %v1949_v9 = vpack.c.bf16 %v1931_v48, %v1930_v17  ;;  %v5395_v25 = vmax.f32 %v5393_v22, %v5394_v20  ;;  %v1951_v50 = vpack.c.bf16 %v1935_v6, %v1934_v24 }
 0x4d4   :  { %3149 = vmatprep.mubr.msk.bf16.mxu0 %vm839_vm2, %v1938_v27  ;;  %3177 = vmatprep.subr.bf16.mxu1 %v3225_v57 }
 0x4d5   :  { %v1950_v19 = vpack.c.bf16 %v5395_v25, %v1932_v31  ;;  %3178 = vmatpush3.bf16.msra.mxu1 %v3225_v57 }
 0x4d6   :  { %3179 = vmatprep.subr.bf16.mxu1 %v3226_v44 }
 0x4d9   :  { %3180 = vmatpush3.bf16.msra.mxu1 %v3226_v44 }
 0x4db   :  { %3150 = vmatmul.mubr.msk.bf16.gmra.mrb[68].mxu0 %vm839_vm2, %v1939_v63 }
 0x4dc   :  { %3153 = vmatprep.mubr.msk.bf16.mxu0 %vm839_vm2, %v1940_v38 }
 0x4e3   :  { %3154 = vmatmul.mubr.msk.bf16.gmra.mrb[72].mxu0 %vm839_vm2, %v1941_v58 }
 0x4e4   :  { %3157 = vmatprep.mubr.msk.bf16.mxu0 %vm839_vm2, %v1942_v10 }
 0x4eb   :  { %3158 = vmatmul.mubr.msk.bf16.gmra.mrb[76].mxu0 %vm839_vm2, %v1943_v11 }
 0x4ec   :  { %3161 = vmatprep.mubr.msk.bf16.mxu0 %vm839_vm2, %v1944_v41 }
 0x4f3   :  { %3162 = vmatmul.mubr.msk.bf16.gmra.mrb[80].mxu0 %vm839_vm2, %v1945_v37 }
 0x4f4   :  { %3165 = vmatprep.mubr.msk.bf16.mxu0 %vm839_vm2, %v1946_v53 }
 0x4fb   :  { %3166 = vmatmul.mubr.msk.bf16.gmra.mrb[84].mxu0 %vm839_vm2, %v1947_v26 }
 0x4fc   :  { %3169 = vmatprep.mubr.msk.bf16.mxu0 %vm839_vm2, %v1948_v60 }
 0x503   :  { %3170 = vmatmul.mubr.msk.bf16.gmra.mrb[88].mxu0 %vm839_vm2, %v1949_v9 }
 0x504   :  { %3173 = vmatprep.mubr.msk.bf16.mxu0 %vm839_vm2, %v1950_v19 }
 0x50b   :  { %3174 = vmatmul.mubr.msk.bf16.gmra.mrb[92].mxu0 %vm839_vm2, %v1951_v50 }
 0x5a6   :  { %v4792_v33 = vpop.f32.mrb[64].mxu0 }
 0x5a7   :  { %v4794_v4 = vpop.f32.mrb[65].mxu0  ;;  %v2264_v32 = vmul.f32 %v4792_v33, %v4792_v33  ;;  %v2196_v2 = vsel %vm293_vm1, %v4792_v33, 0.0 }
 0x5a8   :  { %v2262_v14 = vmul.f32 %v4794_v4, %v4794_v4  ;;  %v4798_v56 = vpop.f32.mrb[66].mxu0  ;;  %v2193_v52 = vsel %vm293_vm1, %v4794_v4, 0.0 }
 0x5a9   :  { %v4800_v61 = vpop.f32.mrb[67].mxu0  ;;  %v2265_v5 = vmul.f32 %v4798_v56, %v4798_v56  ;;  %v2297_v16 = vsel %vm293_vm1, %v2264_v32, 0.0  ;;  %v2198_v51 = vsel %vm293_vm1, %v4798_v56, 0.0 }
 0x5aa   :  { %v2194_v12 = vsel %vm293_vm1, %v4800_v61, 0.0  ;;  %v2263_v15 = vmul.f32 %v4800_v61, %v4800_v61  ;;  %v2294_v35 = vsel %vm293_vm1, %v2262_v14, 0.0 }
 0x5ab   :  { %v2195_v45 = vadd.f32 %v2194_v12, %v2193_v52  ;;  %v2299_v13 = vsel %vm293_vm1, %v2265_v5, 0.0 }
 0x5ac   :  { %v2295_v3 = vsel %vm293_vm1, %v2263_v15, 0.0 }
 0x5ad   :  { %v2197_v59 = vadd.f32 %v2196_v2, %v2195_v45  ;;  %v2296_v21 = vadd.f32 %v2295_v3, %v2294_v35 }
 0x5ae   :  { %v4819_v36 = vpop.f32.mrb[68].mxu0 }
 0x5af   :  { %v2298_v8 = vadd.f32 %v2297_v16, %v2296_v21  ;;  %v4821_v46 = vpop.f32.mrb[69].mxu0  ;;  %v2199_v18 = vadd.f32 %v2198_v51, %v2197_v59  ;;  %v2268_v55 = vmul.f32 %v4819_v36, %v4819_v36  ;;  %v2204_v1 = vsel %vm293_vm1, %v4819_v36, 0.0 }
 0x5b0   :  { %v2200_v29 = vsel %vm293_vm1, %v4821_v46, 0.0  ;;  %v2266_v43 = vmul.f32 %v4821_v46, %v4821_v46  ;;  %v4828_v47 = vpop.f32.mrb[70].mxu0 }
 0x5b1   :  { %v2201_v49 = vadd.f32 %v2200_v29, %v2199_v18  ;;  %v2300_v42 = vadd.f32 %v2299_v13, %v2298_v8  ;;  %v4830_v54 = vpop.f32.mrb[71].mxu0  ;;  %v2269_v7 = vmul.f32 %v4828_v47, %v4828_v47  ;;  %v2305_v31 = vsel %vm293_vm1, %v2268_v55, 0.0 }
 0x5b2   :  { %v2301_v0 = vsel %vm293_vm1, %v2266_v43, 0.0  ;;  %v2202_v62 = vsel %vm293_vm1, %v4830_v54, 0.0  ;;  %v2267_v40 = vmul.f32 %v4830_v54, %v4830_v54  ;;  %v2206_v24 = vsel %vm293_vm1, %v4828_v47, 0.0 }
 0x5b3   :  { %v2302_v34 = vadd.f32 %v2301_v0, %v2300_v42  ;;  %v2203_v39 = vadd.f32 %v2202_v62, %v2201_v49  ;;  %v2307_v63 = vsel %vm293_vm1, %v2269_v7, 0.0 }
 0x5b4   :  { %v2303_v30 = vsel %vm293_vm1, %v2267_v40, 0.0 }
 0x5b5   :  { %v2205_v17 = vadd.f32 %v2204_v1, %v2203_v39  ;;  %v2304_v48 = vadd.f32 %v2303_v30, %v2302_v34 }
 0x5b6   :  { %v4847_v6 = vpop.f32.mrb[72].mxu0 }
 0x5b7   :  { %v2306_v23 = vadd.f32 %v2305_v31, %v2304_v48  ;;  %v4849_v28 = vpop.f32.mrb[73].mxu0  ;;  %v2207_v27 = vadd.f32 %v2206_v24, %v2205_v17  ;;  %v2272_v53 = vmul.f32 %v4847_v6, %v4847_v6  ;;  %v2212_v25 = vsel %vm293_vm1, %v4847_v6, 0.0 }
 0x5b8   :  { %v2208_v38 = vsel %vm293_vm1, %v4849_v28, 0.0  ;;  %v2270_v58 = vmul.f32 %v4849_v28, %v4849_v28  ;;  %v4856_v10 = vpop.f32.mrb[74].mxu0 }
 0x5b9   :  { %v2209_v11 = vadd.f32 %v2208_v38, %v2207_v27  ;;  %v2308_v41 = vadd.f32 %v2307_v63, %v2306_v23  ;;  %v4858_v37 = vpop.f32.mrb[75].mxu0  ;;  %v2273_v19 = vmul.f32 %v4856_v10, %v4856_v10  ;;  %v2313_v14 = vsel %vm293_vm1, %v2272_v53, 0.0 }
 0x5ba   :  { %v2309_v26 = vsel %vm293_vm1, %v2270_v58, 0.0  ;;  %v2210_v60 = vsel %vm293_vm1, %v4858_v37, 0.0  ;;  %v2271_v9 = vmul.f32 %v4858_v37, %v4858_v37  ;;  %v2214_v32 = vsel %vm293_vm1, %v4856_v10, 0.0 }
 0x5bb   :  { %v2310_v22 = vadd.f32 %v2309_v26, %v2308_v41  ;;  %v2211_v20 = vadd.f32 %v2210_v60, %v2209_v11  ;;  %v2315_v2 = vsel %vm293_vm1, %v2273_v19, 0.0 }
 0x5bc   :  { %v2311_v50 = vsel %vm293_vm1, %v2271_v9, 0.0 }
 0x5bd   :  { %v2213_v57 = vadd.f32 %v2212_v25, %v2211_v20  ;;  %v2312_v44 = vadd.f32 %v2311_v50, %v2310_v22 }
 0x5be   :  { %v4875_v52 = vpop.f32.mrb[76].mxu0 }
 0x5bf   :  { %v2314_v12 = vadd.f32 %v2313_v14, %v2312_v44  ;;  %v4877_v15 = vpop.f32.mrb[77].mxu0  ;;  %v2215_v45 = vadd.f32 %v2214_v32, %v2213_v57  ;;  %v2276_v51 = vmul.f32 %v4875_v52, %v4875_v52  ;;  %v2220_v49 = vsel %vm293_vm1, %v4875_v52, 0.0 }
 0x5c0   :  { %v2216_v35 = vsel %vm293_vm1, %v4877_v15, 0.0  ;;  %v2274_v5 = vmul.f32 %v4877_v15, %v4877_v15  ;;  %v4884_v3 = vpop.f32.mrb[78].mxu0 }
 0x5c1   :  { %v2217_v59 = vadd.f32 %v2216_v35, %v2215_v45  ;;  %v2316_v21 = vadd.f32 %v2315_v2, %v2314_v12  ;;  %v4886_v16 = vpop.f32.mrb[79].mxu0  ;;  %v2277_v42 = vmul.f32 %v4884_v3, %v4884_v3  ;;  %v2321_v40 = vsel %vm293_vm1, %v2276_v51, 0.0 }
 0x5c2   :  { %v2317_v8 = vsel %vm293_vm1, %v2274_v5, 0.0  ;;  %v2218_v18 = vsel %vm293_vm1, %v4886_v16, 0.0  ;;  %v2275_v13 = vmul.f32 %v4886_v16, %v4886_v16  ;;  %v2222_v34 = vsel %vm293_vm1, %v4884_v3, 0.0 }
 0x5c3   :  { %v2318_v29 = vadd.f32 %v2317_v8, %v2316_v21  ;;  %v2219_v43 = vadd.f32 %v2218_v18, %v2217_v59  ;;  %v2323_v17 = vsel %vm293_vm1, %v2277_v42, 0.0 }
 0x5c4   :  { %v2319_v55 = vsel %vm293_vm1, %v2275_v13, 0.0 }
 0x5c5   :  { %v2221_v0 = vadd.f32 %v2220_v49, %v2219_v43  ;;  %v2320_v62 = vadd.f32 %v2319_v55, %v2318_v29 }
 0x5c6   :  { %v4903_v39 = vpop.f32.mrb[80].mxu0 }
 0x5c7   :  { %v2322_v1 = vadd.f32 %v2321_v40, %v2320_v62  ;;  %v4905_v7 = vpop.f32.mrb[81].mxu0  ;;  %v2223_v30 = vadd.f32 %v2222_v34, %v2221_v0  ;;  %v2280_v38 = vmul.f32 %v4903_v39, %v4903_v39  ;;  %v2228_v60 = vsel %vm293_vm1, %v4903_v39, 0.0 }
 0x5c8   :  { %v2224_v48 = vsel %vm293_vm1, %v4905_v7, 0.0  ;;  %v2278_v31 = vmul.f32 %v4905_v7, %v4905_v7  ;;  %v4912_v24 = vpop.f32.mrb[82].mxu0 }
 0x5c9   :  { %v2225_v23 = vadd.f32 %v2224_v48, %v2223_v30  ;;  %v2324_v27 = vadd.f32 %v2323_v17, %v2322_v1  ;;  %v4914_v63 = vpop.f32.mrb[83].mxu0  ;;  %v2281_v9 = vmul.f32 %v4912_v24, %v4912_v24  ;;  %v2329_v19 = vsel %vm293_vm1, %v2280_v38, 0.0 }
 0x5ca   :  { %v2325_v58 = vsel %vm293_vm1, %v2278_v31, 0.0  ;;  %v2226_v11 = vsel %vm293_vm1, %v4914_v63, 0.0  ;;  %v2279_v41 = vmul.f32 %v4914_v63, %v4914_v63  ;;  %v2230_v50 = vsel %vm293_vm1, %v4912_v24, 0.0 }
 0x5cb   :  { %v2326_v53 = vadd.f32 %v2325_v58, %v2324_v27  ;;  %v2227_v26 = vadd.f32 %v2226_v11, %v2225_v23  ;;  %v2331_v12 = vsel %vm293_vm1, %v2281_v9, 0.0 }
 0x5cc   :  { %v2327_v22 = vsel %vm293_vm1, %v2279_v41, 0.0 }
 0x5cd   :  { %v2229_v20 = vadd.f32 %v2228_v60, %v2227_v26  ;;  %v2328_v25 = vadd.f32 %v2327_v22, %v2326_v53 }
 0x5ce   :  { %v4931_v57 = vpop.f32.mrb[84].mxu0 }
 0x5cf   :  { %v2330_v44 = vadd.f32 %v2329_v19, %v2328_v25  ;;  %v4933_v14 = vpop.f32.mrb[85].mxu0  ;;  %v2231_v32 = vadd.f32 %v2230_v50, %v2229_v20  ;;  %v2284_v51 = vmul.f32 %v4931_v57, %v4931_v57  ;;  %v2236_v49 = vsel %vm293_vm1, %v4931_v57, 0.0 }
 0x5d0   :  { %v2232_v45 = vsel %vm293_vm1, %v4933_v14, 0.0  ;;  %v2282_v2 = vmul.f32 %v4933_v14, %v4933_v14  ;;  %v4940_v35 = vpop.f32.mrb[86].mxu0 }
 0x5d1   :  { %v2233_v5 = vadd.f32 %v2232_v45, %v2231_v32  ;;  %v2332_v59 = vadd.f32 %v2331_v12, %v2330_v44  ;;  %v4942_v21 = vpop.f32.mrb[87].mxu0  ;;  %v2285_v42 = vmul.f32 %v4940_v35, %v4940_v35  ;;  %v2337_v40 = vsel %vm293_vm1, %v2284_v51, 0.0 }
 0x5d2   :  { %v2333_v8 = vsel %vm293_vm1, %v2282_v2, 0.0  ;;  %v2234_v18 = vsel %vm293_vm1, %v4942_v21, 0.0  ;;  %v2283_v13 = vmul.f32 %v4942_v21, %v4942_v21  ;;  %v2238_v34 = vsel %vm293_vm1, %v4940_v35, 0.0 }
 0x5d3   :  { %v2334_v29 = vadd.f32 %v2333_v8, %v2332_v59  ;;  %v2235_v43 = vadd.f32 %v2234_v18, %v2233_v5  ;;  %v2339_v31 = vsel %vm293_vm1, %v2285_v42, 0.0 }
 0x5d4   :  { %v2335_v55 = vsel %vm293_vm1, %v2283_v13, 0.0 }
 0x5d5   :  { %v2237_v0 = vadd.f32 %v2236_v49, %v2235_v43  ;;  %v2336_v62 = vadd.f32 %v2335_v55, %v2334_v29 }
 0x5d6   :  { %v4959_v1 = vpop.f32.mrb[88].mxu0 }
 0x5d7   :  { %v2338_v30 = vadd.f32 %v2337_v40, %v2336_v62  ;;  %v4961_v17 = vpop.f32.mrb[89].mxu0  ;;  %v2239_v48 = vadd.f32 %v2238_v34, %v2237_v0  ;;  %v2288_v53 = vmul.f32 %v4959_v1, %v4959_v1  ;;  %v2244_v25 = vsel %vm293_vm1, %v4959_v1, 0.0 }
 0x5d8   :  { %v2240_v23 = vsel %vm293_vm1, %v4961_v17, 0.0  ;;  %v2286_v27 = vmul.f32 %v4961_v17, %v4961_v17  ;;  %v4968_v38 = vpop.f32.mrb[90].mxu0 }
 0x5d9   :  { %v2241_v58 = vadd.f32 %v2240_v23, %v2239_v48  ;;  %v2340_v11 = vadd.f32 %v2339_v31, %v2338_v30  ;;  %v4970_v41 = vpop.f32.mrb[91].mxu0  ;;  %v2289_v19 = vmul.f32 %v4968_v38, %v4968_v38  ;;  %v2345_v12 = vsel %vm293_vm1, %v2288_v53, 0.0 }
 0x5da   :  { %v2341_v26 = vsel %vm293_vm1, %v2286_v27, 0.0  ;;  %v2242_v60 = vsel %vm293_vm1, %v4970_v41, 0.0  ;;  %v2287_v9 = vmul.f32 %v4970_v41, %v4970_v41  ;;  %v2246_v45 = vsel %vm293_vm1, %v4968_v38, 0.0 }
 0x5db   :  { %v2342_v22 = vadd.f32 %v2341_v26, %v2340_v11  ;;  %v2243_v20 = vadd.f32 %v2242_v60, %v2241_v58  ;;  %v2347_v8 = vsel %vm293_vm1, %v2289_v19, 0.0 }
 0x5dc   :  { %v2343_v50 = vsel %vm293_vm1, %v2287_v9, 0.0 }
 0x5dd   :  { %v2245_v44 = vadd.f32 %v2244_v25, %v2243_v20  ;;  %v2344_v32 = vadd.f32 %v2343_v50, %v2342_v22 }
 0x5de   :  { %v4987_v2 = vpop.f32.mrb[92].mxu0 }
 0x5df   :  { %v2346_v5 = vadd.f32 %v2345_v12, %v2344_v32  ;;  %v4989_v59 = vpop.f32.mrb[93].mxu0  ;;  %v2247_v51 = vadd.f32 %v2246_v45, %v2245_v44  ;;  %v2292_v55 = vmul.f32 %v4987_v2, %v4987_v2  ;;  %v2252_v48 = vsel %vm293_vm1, %v4987_v2, 0.0 }
 0x5e0   :  { %v2248_v18 = vsel %vm293_vm1, %v4989_v59, 0.0  ;;  %v2290_v13 = vmul.f32 %v4989_v59, %v4989_v59  ;;  %v4996_v29 = vpop.f32.mrb[94].mxu0 }
 0x5e1   :  { %v2249_v43 = vadd.f32 %v2248_v18, %v2247_v51  ;;  %v2348_v49 = vadd.f32 %v2347_v8, %v2346_v5  ;;  %v4998_v42 = vpop.f32.mrb[95].mxu0  ;;  %v2293_v31 = vmul.f32 %v4996_v29, %v4996_v29  ;;  %v2353_v11 = vsel %vm293_vm1, %v2292_v55, 0.0 }
 0x5e2   :  { %v2349_v0 = vsel %vm293_vm1, %v2290_v13, 0.0  ;;  %v2250_v62 = vsel %vm293_vm1, %v4998_v42, 0.0  ;;  %v2291_v40 = vmul.f32 %v4998_v42, %v4998_v42  ;;  %v2254_v53 = vsel %vm293_vm1, %v4996_v29, 0.0 }
 0x5e3   :  { %v2350_v34 = vadd.f32 %v2349_v0, %v2348_v49  ;;  %v2251_v30 = vadd.f32 %v2250_v62, %v2249_v43  ;;  %v2355_v9 = vsel %vm293_vm1, %v2293_v31, 0.0 }
 0x5e4   :  { %v2351_v23 = vsel %vm293_vm1, %v2291_v40, 0.0 }
 0x5e5   :  { %v2253_v27 = vadd.f32 %v2252_v48, %v2251_v30  ;;  %v2352_v58 = vadd.f32 %v2351_v23, %v2350_v34 }
 0x5e7   :  { %v2255_v26 = vadd.f32 %v2254_v53, %v2253_v27  ;;  %v2354_v60 = vadd.f32 %v2353_v11, %v2352_v58 }
 0x5e9   :  { %v2256_v22 = vrot.slane %v2255_v26, 4  ;;  %v2356_v20 = vadd.f32 %v2355_v9, %v2354_v60 }
 0x5eb   :  { %v2257_v25 = vadd.f32 %v2256_v22, %v2255_v26  ;;  %v2357_v19 = vrot.slane %v2356_v20, 4 }
 0x5ed   :  { %v2258_v50 = vrot.slane %v2257_v25, 2  ;;  %v2358_v44 = vadd.f32 %v2357_v19, %v2356_v20 }
 0x5ef   :  { %v2259_v32 = vadd.f32 %v2258_v50, %v2257_v25  ;;  %v2359_v12 = vrot.slane %v2358_v44, 2 }
 0x5f1   :  { %v2260_v45 = vrot.slane %v2259_v32, 1  ;;  %v2360_v5 = vadd.f32 %v2359_v12, %v2358_v44 }
 0x5f3   :  { %v2261_v51 = vadd.f32 %v2260_v45, %v2259_v32  ;;  %v2361_v8 = vrot.slane %v2360_v5, 1 }
 0x5f5   :  { %v2362_v18 = vadd.f32 %v2361_v8, %v2360_v5  ;;  %v5016_v13 = vmul.f32 0.00390625, %v2261_v51 }
 0x5f7   :  { %v2364_v43 = vmul.f32 0.00390625, %v2362_v18  ;;  %v2365_v49 = vmul.f32 %v5016_v13, %v5016_v13  ;;  %v2396_v55 = vsub.f32 %v4998_v42, %v5016_v13  ;;  %v2367_v0 = vsub.f32 %v4794_v4, %v5016_v13 }
 0x5f8   :  { %v2368_v62 = vsub.f32 %v4800_v61, %v5016_v13  ;;  %v2369_v40 = vsub.f32 %v4792_v33, %v5016_v13  ;;  %v2370_v34 = vsub.f32 %v4798_v56, %v5016_v13  ;;  %v2371_v30 = vsub.f32 %v4821_v46, %v5016_v13 }
 0x5f9   :  { %v2366_v48 = vsub.f32 %v2364_v43, %v2365_v49  ;;  %v2372_v31 = vsub.f32 %v4830_v54, %v5016_v13  ;;  %v2373_v42 = vsub.f32 %v4819_v36, %v5016_v13  ;;  %v2374_v4 = vsub.f32 %v4828_v47, %v5016_v13 }
 0x5fa   :  { %v2375_v61 = vsub.f32 %v4849_v28, %v5016_v13  ;;  %v2376_v33 = vsub.f32 %v4858_v37, %v5016_v13  ;;  %v2377_v56 = vsub.f32 %v4847_v6, %v5016_v13  ;;  %v2378_v46 = vsub.f32 %v4856_v10, %v5016_v13 }
 0x5fb   :  { %v2399_v23 = vadd.f32 1e-05, %v2366_v48  ;;  %v2379_v54 = vsub.f32 %v4877_v15, %v5016_v13  ;;  %v2380_v36 = vsub.f32 %v4886_v16, %v5016_v13  ;;  %v2381_v47 = vsub.f32 %v4875_v52, %v5016_v13 }
 0x5fc   :  { %v2382_v28 = vsub.f32 %v4884_v3, %v5016_v13  ;;  %v2383_v37 = vsub.f32 %v4905_v7, %v5016_v13  ;;  %v2384_v6 = vsub.f32 %v4914_v63, %v5016_v13  ;;  %v2385_v10 = vsub.f32 %v4903_v39, %v5016_v13 }
 0x5fd   :  { %3233 = vrsqrt.f32 %v2399_v23  ;;  %v2386_v15 = vsub.f32 %v4912_v24, %v5016_v13  ;;  %v2387_v16 = vsub.f32 %v4933_v14, %v5016_v13  ;;  %v2388_v52 = vsub.f32 %v4942_v21, %v5016_v13 }
 0x5fe   :  { %v2389_v3 = vsub.f32 %v4931_v57, %v5016_v13  ;;  %v2390_v7 = vsub.f32 %v4940_v35, %v5016_v13  ;;  %v2391_v63 = vsub.f32 %v4961_v17, %v5016_v13  ;;  %v2392_v39 = vsub.f32 %v4970_v41, %v5016_v13 }
 0x5ff   :  { %v2393_v24 = vsub.f32 %v4959_v1, %v5016_v13  ;;  %v2394_v14 = vsub.f32 %v4968_v38, %v5016_v13  ;;  %v2395_v21 = vsub.f32 %v4989_v59, %v5016_v13  ;;  %v2397_v57 = vsub.f32 %v4987_v2, %v5016_v13 }
 0x600   :  { %v2398_v35 = vsub.f32 %v4996_v29, %v5016_v13 }
 0x607   :  { %v3234_v27 = vpop.eup %3233 }
 0x608   :  { %v5084_v17 = vmul.f32 %v3234_v27, %v2396_v55  ;;  %v5086_v58 = vmul.f32 %v3234_v27, %v2367_v0  ;;  %v5088_v41 = vmul.f32 %v3234_v27, %v2368_v62  ;;  %v5090_v1 = vmul.f32 %v3234_v27, %v2369_v40 }
 0x609   :  { %v5092_v11 = vmul.f32 %v3234_v27, %v2370_v34  ;;  %v5094_v38 = vmul.f32 %v3234_v27, %v2371_v30  ;;  %v5096_v59 = vmul.f32 %v3234_v27, %v2372_v31  ;;  %v5098_v53 = vmul.f32 %v3234_v27, %v2373_v42 }
 0x60a   :  { %5396 = vst [vmem:[#allocation2_spill] sm:$0xff] %v5084_v17  ;;  %v5100_v2 = vmul.f32 %v3234_v27, %v2374_v4  ;;  %v5102_v29 = vmul.f32 %v3234_v27, %v2375_v61  ;;  %v5104_v26 = vmul.f32 %v3234_v27, %v2376_v33  ;;  %v5106_v60 = vmul.f32 %v3234_v27, %v2377_v56 }
 0x60b   :  { %v5108_v9 = vmul.f32 %v3234_v27, %v2378_v46  ;;  %v5110_v22 = vmul.f32 %v3234_v27, %v2379_v54  ;;  %v5112_v20 = vmul.f32 %v3234_v27, %v2380_v36  ;;  %v5115_v25 = vmul.f32 0.01, %v5084_v17 }
 0x60c   :  { %v5117_v19 = vmul.f32 %v3234_v27, %v2381_v47  ;;  %v5119_v50 = vmul.f32 %v3234_v27, %v2382_v28  ;;  %v5121_v44 = vmul.f32 %v3234_v27, %v2383_v37  ;;  %v5123_v32 = vmul.f32 %v3234_v27, %v2384_v6 }
 0x60d   :  { %5397 = vst [vmem:[#allocation3_spill] sm:$0xff] %v5115_v25  ;;  %v5125_v12 = vmul.f32 %v3234_v27, %v2385_v10  ;;  %v5127_v45 = vmul.f32 %v3234_v27, %v2386_v15  ;;  %v5129_v5 = vmul.f32 %v3234_v27, %v2387_v16  ;;  %v5131_v51 = vmul.f32 %v3234_v27, %v2388_v52 }
 0x60e   :  { %v5133_v8 = vmul.f32 %v3234_v27, %v2389_v3  ;;  %v5135_v18 = vmul.f32 %v3234_v27, %v2390_v7  ;;  %v5137_v13 = vmul.f32 %v3234_v27, %v2391_v63  ;;  %v5139_v43 = vmul.f32 %v3234_v27, %v2392_v39 }
 0x60f   :  { %v5141_v49 = vmul.f32 %v3234_v27, %v2393_v24  ;;  %v5143_v55 = vmul.f32 %v3234_v27, %v2394_v14  ;;  %v5145_v0 = vmul.f32 %v3234_v27, %v2395_v21  ;;  %v5147_v62 = vmul.f32 %v3234_v27, %v2397_v57 }
 0x610   :  { %v5149_v40 = vmul.f32 %v3234_v27, %v2398_v35  ;;  %v5152_v34 = vmul.f32 0.01, %v5086_v58  ;;  %v5155_v30 = vmul.f32 0.01, %v5088_v41  ;;  %v2435_v31 = vmul.f32 0.01, %v5090_v1 }
 0x611   :  { %v2436_v42 = vmul.f32 0.01, %v5092_v11  ;;  %v2437_v4 = vmul.f32 0.01, %v5094_v38  ;;  %v2438_v61 = vmul.f32 0.01, %v5096_v59 }
 0x612   :  { %v2439_v33 = vmul.f32 0.01, %v5098_v53  ;;  %v2440_v56 = vmul.f32 0.01, %v5100_v2  ;;  %v2465_v46 = vmax.f32 %v5086_v58, %v5152_v34  ;;  %v2441_v23 = vmul.f32 0.01, %v5102_v29 }
 0x613   :  { %v2442_v54 = vmul.f32 0.01, %v5104_v26  ;;  %v2443_v36 = vmul.f32 0.01, %v5106_v60  ;;  %v2466_v47 = vmax.f32 %v5088_v41, %v5155_v30  ;;  %v2444_v28 = vmul.f32 0.01, %v5108_v9 }
 0x614   :  { %v2445_v37 = vmul.f32 0.01, %v5110_v22  ;;  %v2446_v6 = vmul.f32 0.01, %v5112_v20  ;;  %v2467_v10 = vmax.f32 %v5090_v1, %v2435_v31  ;;  %v2447_v15 = vmul.f32 0.01, %v5117_v19 }
 0x615   :  { %v2448_v16 = vmul.f32 0.01, %v5119_v50  ;;  %v2449_v52 = vmul.f32 0.01, %v5121_v44  ;;  %v2468_v3 = vmax.f32 %v5092_v11, %v2436_v42  ;;  %v2450_v7 = vmul.f32 0.01, %v5123_v32 }
 0x616   :  { %v2451_v63 = vmul.f32 0.01, %v5125_v12  ;;  %v2452_v39 = vmul.f32 0.01, %v5127_v45  ;;  %v2469_v24 = vmax.f32 %v5094_v38, %v2437_v4  ;;  %v2453_v14 = vmul.f32 0.01, %v5129_v5 }
 0x617   :  { %v2454_v21 = vmul.f32 0.01, %v5131_v51  ;;  %v2455_v57 = vmul.f32 0.01, %v5133_v8  ;;  %v2470_v35 = vmax.f32 %v5096_v59, %v2438_v61  ;;  %v2456_v27 = vmul.f32 0.01, %v5135_v18 }
 0x618   :  { %v2457_v58 = vmul.f32 0.01, %v5137_v13  ;;  %v2458_v41 = vmul.f32 0.01, %v5139_v43  ;;  %v2471_v1 = vmax.f32 %v5098_v53, %v2439_v33  ;;  %v2459_v11 = vmul.f32 0.01, %v5141_v49 }
 0x619   :  { %v2460_v38 = vmul.f32 0.01, %v5143_v55  ;;  %v2461_v34 = vmul.f32 0.01, %v5145_v0  ;;  %v2472_v30 = vmax.f32 %v5100_v2, %v2440_v56  ;;  %v2463_v31 = vmul.f32 0.01, %v5147_v62 }
 0x61a   :  { %v2464_v59 = vmul.f32 0.01, %v5149_v40  ;;  %v2473_v42 = vmax.f32 %v5102_v29, %v2441_v23  ;;  %v2474_v4 = vmax.f32 %v5104_v26, %v2442_v54  ;;  %v2475_v61 = vmax.f32 %v5106_v60, %v2443_v36 }
 0x61b   :  { %v2476_v53 = vmax.f32 %v5108_v9, %v2444_v28  ;;  %v2477_v33 = vmax.f32 %v5110_v22, %v2445_v37  ;;  %v2478_v48 = vmax.f32 %v5112_v20, %v2446_v6  ;;  %v2479_v25 = vmax.f32 %v5117_v19, %v2447_v15  ;;  %v5398_v6 = vld [vmem:[#allocation2_spill] sm:$0xff] }
 0x61c   :  { %v2480_v2 = vmax.f32 %v5119_v50, %v2448_v16  ;;  %v2481_v56 = vmax.f32 %v5121_v44, %v2449_v52  ;;  %v2482_v17 = vmax.f32 %v5123_v32, %v2450_v7  ;;  %v2483_v29 = vmax.f32 %v5125_v12, %v2451_v63 }
 0x61d   :  { %v2484_v26 = vmax.f32 %v5127_v45, %v2452_v39  ;;  %v2485_v60 = vmax.f32 %v5129_v5, %v2453_v14  ;;  %v2486_v9 = vmax.f32 %v5131_v51, %v2454_v21  ;;  %v2487_v22 = vmax.f32 %v5133_v8, %v2455_v57 }
 0x61e   :  { %v2488_v20 = vmax.f32 %v5135_v18, %v2456_v27  ;;  %v2489_v19 = vmax.f32 %v5137_v13, %v2457_v58  ;;  %v2490_v50 = vmax.f32 %v5139_v43, %v2458_v41  ;;  %v2491_v44 = vmax.f32 %v5141_v49, %v2459_v11 }
 0x61f   :  { %v2492_v32 = vmax.f32 %v5143_v55, %v2460_v38  ;;  %v2493_v12 = vmax.f32 %v5145_v0, %v2461_v34  ;;  %v2495_v45 = vmax.f32 %v5147_v62, %v2463_v31  ;;  %v2496_v5 = vmax.f32 %v5149_v40, %v2464_v59  ;;  %v5399_v40 = vld [vmem:[#allocation3_spill] sm:$0xff] }
 0x620   :  { %v2498_v23 = vpack.c.bf16 %v2468_v3, %v2467_v10  ;;  %v2497_v51 = vpack.c.bf16 %v2466_v47, %v2465_v46  ;;  %v2499_v54 = vpack.c.bf16 %v2470_v35, %v2469_v24  ;;  %v2500_v8 = vpack.c.bf16 %v2472_v30, %v2471_v1 }
 0x621   :  { %v2501_v36 = vpack.c.bf16 %v2474_v4, %v2473_v42  ;;  %v2502_v18 = vpack.c.bf16 %v2476_v53, %v2475_v61  ;;  %v2503_v28 = vpack.c.bf16 %v2478_v48, %v2477_v33  ;;  %v2504_v13 = vpack.c.bf16 %v2480_v2, %v2479_v25 }
 0x622   :  { %3181 = vmatprep.mubr.msk.bf16.mxu1 %vm293_vm1, %v2497_v51  ;;  %v2505_v43 = vpack.c.bf16 %v2482_v17, %v2481_v56  ;;  %v2506_v49 = vpack.c.bf16 %v2484_v26, %v2483_v29  ;;  %v2507_v37 = vpack.c.bf16 %v2486_v9, %v2485_v60  ;;  %v2508_v55 = vpack.c.bf16 %v2488_v20, %v2487_v22 }
 0x623   :  { %3182 = vmatmul.mubr.msk.bf16.vlgmr.msra.gmra.mrb[64].mxu1 %vm293_vm1, %v2498_v23  ;;  %v2509_v0 = vpack.c.bf16 %v2490_v50, %v2489_v19  ;;  %v2510_v62 = vpack.c.bf16 %v2492_v32, %v2491_v44  ;;  %v5400_v10 = vmax.f32 %v5398_v6, %v5399_v40  ;;  %v2512_v47 = vpack.c.bf16 %v2496_v5, %v2495_v45 }
 0x624   :  { %3185 = vmatprep.mubr.msk.bf16.mxu1 %vm293_vm1, %v2499_v54 }
 0x625   :  { %v2511_v46 = vpack.c.bf16 %v5400_v10, %v2493_v12 }
 0x62b   :  { %3186 = vmatmul.mubr.msk.bf16.gmra.mrb[68].mxu1 %vm293_vm1, %v2500_v8 }
 0x62c   :  { %3189 = vmatprep.mubr.msk.bf16.mxu1 %vm293_vm1, %v2501_v36 }
 0x633   :  { %3190 = vmatmul.mubr.msk.bf16.gmra.mrb[72].mxu1 %vm293_vm1, %v2502_v18 }
 0x634   :  { %3193 = vmatprep.mubr.msk.bf16.mxu1 %vm293_vm1, %v2503_v28 }
 0x63b   :  { %3194 = vmatmul.mubr.msk.bf16.gmra.mrb[76].mxu1 %vm293_vm1, %v2504_v13 }
 0x63c   :  { %3197 = vmatprep.mubr.msk.bf16.mxu1 %vm293_vm1, %v2505_v43 }
 0x643   :  { %3198 = vmatmul.mubr.msk.bf16.gmra.mrb[80].mxu1 %vm293_vm1, %v2506_v49 }
 0x644   :  { %3201 = vmatprep.mubr.msk.bf16.mxu1 %vm293_vm1, %v2507_v37 }
 0x64b   :  { %3202 = vmatmul.mubr.msk.bf16.gmra.mrb[84].mxu1 %vm293_vm1, %v2508_v55 }
 0x64c   :  { %3205 = vmatprep.mubr.msk.bf16.mxu1 %vm293_vm1, %v2509_v0 }
 0x653   :  { %3206 = vmatmul.mubr.msk.bf16.gmra.mrb[88].mxu1 %vm293_vm1, %v2510_v62 }
 0x654   :  { %3209 = vmatprep.mubr.msk.bf16.mxu1 %vm293_vm1, %v2511_v46 }
 0x65b   :  { %3210 = vmatmul.mubr.msk.bf16.gmra.mrb[92].mxu1 %vm293_vm1, %v2512_v47 }
 0x6f6   :  { %v3183_v17 = vpop.f32.mrb[64].mxu1 }
 0x6f7   :  { %2740 = vst.msk [vmem:[%s5375_s7 + $0x10] sm:$0xff] %vm83_vm0, %v3183_v17  ;;  %v2611_v25 = vpop.f32.mrb[65].mxu1 }
 0x6f8   :  { %2738 = vst.msk [vmem:[%s5375_s7] sm:$0xff] %vm83_vm0, %v2611_v25  ;;  %v3184_v48 = vpop.f32.mrb[66].mxu1 }
 0x6f9   :  { %2741 = vst.msk [vmem:[%s5375_s7 + $0x18] sm:$0xff] %vm83_vm0, %v3184_v48  ;;  %v2614_v15 = vpop.f32.mrb[67].mxu1 }
 0x6fa   :  { %2739 = vst.msk [vmem:[%s5375_s7 + $0x8] sm:$0xff] %vm83_vm0, %v2614_v15 }
 0x6fe   :  { %v3187_v16 = vpop.f32.mrb[68].mxu1 }
 0x6ff   :  { %2744 = vst.msk [vmem:[%s5375_s7 + $0x30] sm:$0xff] %vm83_vm0, %v3187_v16  ;;  %v2627_v52 = vpop.f32.mrb[69].mxu1 }
 0x700   :  { %2742 = vst.msk [vmem:[%s5375_s7 + $0x20] sm:$0xff] %vm83_vm0, %v2627_v52  ;;  %v3188_v3 = vpop.f32.mrb[70].mxu1 }
 0x701   :  { %2745 = vst.msk [vmem:[%s5375_s7 + $0x38] sm:$0xff] %vm83_vm0, %v3188_v3  ;;  %v2630_v7 = vpop.f32.mrb[71].mxu1 }
 0x702   :  { %2743 = vst.msk [vmem:[%s5375_s7 + $0x28] sm:$0xff] %vm83_vm0, %v2630_v7 }
 0x706   :  { %v3191_v63 = vpop.f32.mrb[72].mxu1 }
 0x707   :  { %2748 = vst.msk [vmem:[%s5375_s7 + $0x50] sm:$0xff] %vm83_vm0, %v3191_v63  ;;  %v2643_v39 = vpop.f32.mrb[73].mxu1 }
 0x708   :  { %2746 = vst.msk [vmem:[%s5375_s7 + $0x40] sm:$0xff] %vm83_vm0, %v2643_v39  ;;  %v3192_v24 = vpop.f32.mrb[74].mxu1 }
 0x709   :  { %2749 = vst.msk [vmem:[%s5375_s7 + $0x58] sm:$0xff] %vm83_vm0, %v3192_v24  ;;  %v2646_v14 = vpop.f32.mrb[75].mxu1 }
 0x70a   :  { %2747 = vst.msk [vmem:[%s5375_s7 + $0x48] sm:$0xff] %vm83_vm0, %v2646_v14 }
 0x70e   :  { %v3195_v21 = vpop.f32.mrb[76].mxu1 }
 0x70f   :  { %2752 = vst.msk [vmem:[%s5375_s7 + $0x70] sm:$0xff] %vm83_vm0, %v3195_v21  ;;  %v2659_v57 = vpop.f32.mrb[77].mxu1 }
 0x710   :  { %2750 = vst.msk [vmem:[%s5375_s7 + $0x60] sm:$0xff] %vm83_vm0, %v2659_v57  ;;  %v3196_v35 = vpop.f32.mrb[78].mxu1 }
 0x711   :  { %2753 = vst.msk [vmem:[%s5375_s7 + $0x78] sm:$0xff] %vm83_vm0, %v3196_v35  ;;  %v2662_v27 = vpop.f32.mrb[79].mxu1 }
 0x712   :  { %2751 = vst.msk [vmem:[%s5375_s7 + $0x68] sm:$0xff] %vm83_vm0, %v2662_v27 }
 0x716   :  { %v3199_v58 = vpop.f32.mrb[80].mxu1 }
 0x717   :  { %2756 = vst.msk [vmem:[%s5375_s7 + $0x90] sm:$0xff] %vm83_vm0, %v3199_v58  ;;  %v2675_v41 = vpop.f32.mrb[81].mxu1 }
 0x718   :  { %2754 = vst.msk [vmem:[%s5375_s7 + $0x80] sm:$0xff] %vm83_vm0, %v2675_v41  ;;  %v3200_v1 = vpop.f32.mrb[82].mxu1 }
 0x719   :  { %2757 = vst.msk [vmem:[%s5375_s7 + $0x98] sm:$0xff] %vm83_vm0, %v3200_v1  ;;  %v2678_v11 = vpop.f32.mrb[83].mxu1 }
 0x71a   :  { %2755 = vst.msk [vmem:[%s5375_s7 + $0x88] sm:$0xff] %vm83_vm0, %v2678_v11 }
 0x71e   :  { %v3203_v38 = vpop.f32.mrb[84].mxu1 }
 0x71f   :  { %2760 = vst.msk [vmem:[%s5375_s7 + $0xb0] sm:$0xff] %vm83_vm0, %v3203_v38  ;;  %v2691_v34 = vpop.f32.mrb[85].mxu1 }
 0x720   :  { %2758 = vst.msk [vmem:[%s5375_s7 + $0xa0] sm:$0xff] %vm83_vm0, %v2691_v34  ;;  %v3204_v30 = vpop.f32.mrb[86].mxu1 }
 0x721   :  { %2761 = vst.msk [vmem:[%s5375_s7 + $0xb8] sm:$0xff] %vm83_vm0, %v3204_v30  ;;  %v2694_v31 = vpop.f32.mrb[87].mxu1 }
 0x722   :  { %2759 = vst.msk [vmem:[%s5375_s7 + $0xa8] sm:$0xff] %vm83_vm0, %v2694_v31 }
 0x726   :  { %v3207_v59 = vpop.f32.mrb[88].mxu1 }
 0x727   :  { %2764 = vst.msk [vmem:[%s5375_s7 + $0xd0] sm:$0xff] %vm83_vm0, %v3207_v59  ;;  %v2707_v42 = vpop.f32.mrb[89].mxu1 }
 0x728   :  { %2762 = vst.msk [vmem:[%s5375_s7 + $0xc0] sm:$0xff] %vm83_vm0, %v2707_v42  ;;  %v3208_v4 = vpop.f32.mrb[90].mxu1 }
 0x729   :  { %2765 = vst.msk [vmem:[%s5375_s7 + $0xd8] sm:$0xff] %vm83_vm0, %v3208_v4  ;;  %v2710_v61 = vpop.f32.mrb[91].mxu1 }
 0x72a   :  { %2763 = vst.msk [vmem:[%s5375_s7 + $0xc8] sm:$0xff] %vm83_vm0, %v2710_v61 }
 0x72e   :  { %v3211_v53 = vpop.f32.mrb[92].mxu1 }
 0x72f   :  { %2768 = vst.msk [vmem:[%s5375_s7 + $0xf0] sm:$0xff] %vm83_vm0, %v3211_v53  ;;  %v2723_v33 = vpop.f32.mrb[93].mxu1 }
 0x730   :  { %2766 = vst.msk [vmem:[%s5375_s7 + $0xe0] sm:$0xff] %vm83_vm0, %v2723_v33  ;;  %v3212_v2 = vpop.f32.mrb[94].mxu1 }
 0x731   :  { %2769 = vst.msk [vmem:[%s5375_s7 + $0xf8] sm:$0xff] %vm83_vm0, %v3212_v2  ;;  %v2726_v56 = vpop.f32.mrb[95].mxu1 }
 0x732   :  { %2767 = vst.msk [vmem:[%s5375_s7 + $0xe8] sm:$0xff] %vm83_vm0, %v2726_v56 }

</bundles_post_ra>
